<compile_context>
chip_gen: v7x
topology: tpu7x:2x2x1
jax: 0.10.0
libtpu: 0.0.40
codegen_flags: <defaults>
</compile_context>

<pallas_src>
import functools

import jax
import jax.numpy as jnp
from jax.experimental import pallas as pl
from jax.experimental.pallas import tpu as pltpu

NUM_NODE_EMB_LIST = [7, 4]
NUM_EDGE_EMB_LIST = [5, 3]
NUM_LAYERS = 5
EMB_DIM = 32
N_TASKS = 1
BN_EPS = 1e-5

EMB_PAD = 128      # feature axis padded to a full 128-lane vreg
HID_PAD = 128      # hidden (2*emb = 64) padded to 128
OUT_PAD = 128      # prediction-head output lanes (sliced back to N_TASKS outside)
NODE_PAD = 128     # node bucket: multiple of 128 -> lane-dense bf16 A, no recompiles
EDGE_PAD = 64      # edge bucket: runtime edge-valid mask, no recompiles


# ---------------------------------------------------------------------------
# Fused Pallas kernel: 5 layers + mean readout + prediction head, per graph
# ---------------------------------------------------------------------------
def _gine_fused_kernel(num_layers,
                       n_ref,                                   # [G] int32, SMEM
                       a_ref, h0_ref, agge_ref, mask_ref,       # per-graph blocks
                       w1_ref, b1_ref, w2_ref, b2_ref,          # shared (VMEM resident)
                       wp_ref, bp_ref,
                       out_ref):
    g = pl.program_id(0)
    a = a_ref[...]                        # [Np, Np] bf16 adjacency (exact small ints)
    h = h0_ref[...]                       # [Np, EMB_PAD] f32, resident all layers
    for l in range(num_layers):           # static unroll (L = 5)
        # agg_v = sum_{e: dst=v} (h[src(e)] + ee[e])  ==  A @ h  +  segsum_dst(ee_l)
        agg = jnp.dot(a, h.astype(jnp.bfloat16),
                      preferred_element_type=jnp.float32)
        agg = agg + agge_ref[l].astype(jnp.float32)
        # MLP: Linear(emb,2emb) -> ReLU -> Linear(2emb,emb); BN folded into w2/b2
        h1 = jnp.dot(agg.astype(jnp.bfloat16), w1_ref[l],
                     preferred_element_type=jnp.float32) + b1_ref[l]
        h1 = jnp.maximum(h1, 0.0)
        h = jnp.dot(h1.astype(jnp.bfloat16), w2_ref[l],
                    preferred_element_type=jnp.float32) + b2_ref[l]
        if l < num_layers - 1:             # JK='last': ReLU on all but last layer
            h = jnp.maximum(h, 0.0)
        # dropout(p=0.5): identity in eval mode
    # mean readout: [1,Np] 0/1 mask-row matmul on the MXU, exact 1/n from SMEM
    n = jnp.maximum(n_ref[g], 1).astype(jnp.float32)
    gf = jnp.dot(mask_ref[...], h.astype(jnp.bfloat16),
                 preferred_element_type=jnp.float32) * (1.0 / n)      # [1, EMB_PAD]
    out_ref[...] = (jnp.dot(gf.astype(jnp.bfloat16), wp_ref[...],
                            preferred_element_type=jnp.float32) + bp_ref[...])


# ---------------------------------------------------------------------------
# pallas_call wrapper (batch-of-graphs grid, scalar-prefetched node counts)
# ---------------------------------------------------------------------------
def gine_fused(n_nodes, A, h0, aggE, mask, w1, b1, w2, b2, wp, bp):
    G, Np, _ = A.shape
    L = aggE.shape[1]
    resident = pl.BlockSpec(memory_space=pltpu.MemorySpace.VMEM)   # single-buffered
    grid_spec = pltpu.PrefetchScalarGridSpec(
        num_scalar_prefetch=1,                 # n_nodes -> SMEM, available to kernel
        grid=(G,),
        in_specs=[
            pl.BlockSpec((None, Np, Np), lambda g, n: (g, 0, 0)),            # A
            pl.BlockSpec((None, Np, EMB_PAD), lambda g, n: (g, 0, 0)),       # h0
            pl.BlockSpec((None, L, Np, EMB_PAD), lambda g, n: (g, 0, 0, 0)), # aggE
            pl.BlockSpec((None, 1, Np), lambda g, n: (g, 0, 0)),             # mask
            resident, resident, resident, resident, resident, resident,      # weights
        ],
        out_specs=pl.BlockSpec((None, 1, OUT_PAD), lambda g, n: (g, 0, 0)),
    )
    return pl.pallas_call(
        functools.partial(_gine_fused_kernel, NUM_LAYERS),
        grid_spec=grid_spec,
        out_shape=jax.ShapeDtypeStruct((G, 1, OUT_PAD), jnp.float32),
        compiler_params=pltpu.CompilerParams(
            dimension_semantics=("parallel",),
            vmem_limit_bytes=32 * 1024 * 1024),
    )(n_nodes, A, h0, aggE, mask, w1, b1, w2, b2, wp, bp)


# ---------------------------------------------------------------------------
# Parameters (deterministic init; shapes follow GINPredictor.__init__)
# ---------------------------------------------------------------------------
def _xavier_uniform(key, shape):
    fan_in, fan_out = shape
    limit = (6.0 / (fan_in + fan_out)) ** 0.5
    return jax.random.uniform(key, shape, jnp.float32, -limit, limit)


def init_params(key):
    keys = iter(jax.random.split(key, 64))
    node_emb = [_xavier_uniform(next(keys), (n, EMB_DIM)) for n in NUM_NODE_EMB_LIST]
    layers = []
    for _ in range(NUM_LAYERS):
        layers.append(dict(
            edge_emb=[_xavier_uniform(next(keys), (n, EMB_DIM))
                      for n in NUM_EDGE_EMB_LIST],
            w1=_xavier_uniform(next(keys), (EMB_DIM, 2 * EMB_DIM)),
            b1=jnp.zeros((1, 2 * EMB_DIM), jnp.float32),
            w2=_xavier_uniform(next(keys), (2 * EMB_DIM, EMB_DIM)),
            b2=jnp.zeros((1, EMB_DIM), jnp.float32),
            gamma=jnp.ones((1, EMB_DIM), jnp.float32),
            beta=jnp.zeros((1, EMB_DIM), jnp.float32),
            rmean=jnp.zeros((1, EMB_DIM), jnp.float32),
            rvar=jnp.ones((1, EMB_DIM), jnp.float32),
        ))
    wp = _xavier_uniform(next(keys), (EMB_DIM, N_TASKS))
    bp = jnp.zeros((1, N_TASKS), jnp.float32)
    return dict(node_emb=node_emb, layers=layers, wp=wp, bp=bp)


# ---------------------------------------------------------------------------
# Lightweight XLA glue: O(E) graph prep + BN folding/padding, then ONE kernel.
# ---------------------------------------------------------------------------
def _pad_to(x, shape):
    return jnp.pad(x, [(0, t - s) for s, t in zip(x.shape, shape)])


def _prep_graph(params, src, dst, x_cat, w_cat, num_nodes, num_edges):
    """Per-graph prep (vmapped). src/dst: [Ep], x_cat: [Np,2], w_cat: [Ep,2]."""
    node_valid = jnp.arange(NODE_PAD) < num_nodes                      # [Np]
    edge_valid = (jnp.arange(EDGE_PAD) < num_edges).astype(jnp.float32)

    # node embedding sum -> padded [Np, EMB_PAD] f32 (padded rows zeroed)
    h0 = sum(emb[x_cat[:, i]] for i, emb in enumerate(params["node_emb"]))
    h0 = jnp.where(node_valid[:, None], h0, 0.0)
    h0 = _pad_to(h0.astype(jnp.float32), (NODE_PAD, EMB_PAD))

    # adjacency via O(E) scatter-add (exact small ints -> bf16)
    A = jnp.zeros((NODE_PAD, NODE_PAD), jnp.float32).at[dst, src].add(edge_valid)
    A = A.astype(jnp.bfloat16)

    # per-layer edge-embedding sums scattered onto dst: aggE[l] = segsum_dst(ee_l)
    ee_all = jnp.stack([
        sum(emb[w_cat[:, i]] for i, emb in enumerate(lp["edge_emb"]))
        for lp in params["layers"]])                                   # [L, Ep, emb]
    ee_all = ee_all * edge_valid[None, :, None]
    aggE = jax.vmap(
        lambda ee: jax.ops.segment_sum(ee, dst, num_segments=NODE_PAD))(ee_all)
    aggE = _pad_to(aggE, (NUM_LAYERS, NODE_PAD, EMB_PAD)).astype(jnp.bfloat16)

    # readout mask row (exact 0/1 in bf16); 1/n applied in-kernel from SMEM
    mask = node_valid.astype(jnp.bfloat16)[None, :]                    # [1, Np]
    return A, h0, aggE, mask


def _fold_and_pad_params(params):
    w1 = jnp.stack([_pad_to(lp["w1"], (EMB_PAD, HID_PAD))
                    for lp in params["layers"]]).astype(jnp.bfloat16)
    b1 = jnp.stack([_pad_to(lp["b1"], (1, HID_PAD)) for lp in params["layers"]])
    w2f, b2f = [], []
    for lp in params["layers"]:
        scale = lp["gamma"] * jax.lax.rsqrt(lp["rvar"] + BN_EPS)       # [1, emb]
        w2f.append(_pad_to(lp["w2"] * scale, (HID_PAD, EMB_PAD)))
        b2f.append(_pad_to((lp["b2"] - lp["rmean"]) * scale + lp["beta"],
                           (1, EMB_PAD)))
    w2f = jnp.stack(w2f).astype(jnp.bfloat16)
    b2f = jnp.stack(b2f)
    wp = _pad_to(params["wp"], (EMB_PAD, OUT_PAD)).astype(jnp.bfloat16)
    bp = _pad_to(params["bp"], (1, OUT_PAD))
    return w1, b1, w2f, b2f, wp, bp


def gine_forward(params, src_b, dst_b, x_b, w_b, n_nodes, n_edges):
    """Batched forward.  src_b/dst_b: [G,Ep] i32, x_b: [G,Np,2], w_b: [G,Ep,2],
    n_nodes/n_edges: [G] i32 (runtime; no recompile per graph size)."""
    A, h0, aggE, mask = jax.vmap(functools.partial(_prep_graph, params))(
        src_b, dst_b, x_b, w_b, n_nodes, n_edges)
    w1, b1, w2, b2, wp, bp = _fold_and_pad_params(params)
    out = gine_fused(n_nodes, A, h0, aggE, mask, w1, b1, w2, b2, wp, bp)
    return out[:, 0, :N_TASKS]                                         # [G, n_tasks]


gine_forward_jit = jax.jit(gine_forward)


# ---------------------------------------------------------------------------
# Pure-JAX f32 reference (gather/scatter semantics, eval mode) for validation
# ---------------------------------------------------------------------------
def gine_reference(params, src, dst, x_cat, w_cat, num_nodes, num_edges):
    nv = jnp.arange(x_cat.shape[0]) < num_nodes
    ev = (jnp.arange(src.shape[0]) < num_edges).astype(jnp.float32)
    h = sum(emb[x_cat[:, i]] for i, emb in enumerate(params["node_emb"]))
    h = jnp.where(nv[:, None], h, 0.0)
    for l, lp in enumerate(params["layers"]):
        ee = sum(emb[w_cat[:, i]] for i, emb in enumerate(lp["edge_emb"]))
        msg = (h[src] + ee) * ev[:, None]
        agg = jax.ops.segment_sum(msg, dst, num_segments=x_cat.shape[0])
        h1 = jnp.maximum(agg @ lp["w1"] + lp["b1"], 0.0)
        h2 = h1 @ lp["w2"] + lp["b2"]
        h2 = (h2 - lp["rmean"]) * lp["gamma"] * jax.lax.rsqrt(lp["rvar"] + BN_EPS) \
             + lp["beta"]
        h = jnp.maximum(h2, 0.0) if l < NUM_LAYERS - 1 else h2
    h = jnp.where(nv[:, None], h, 0.0)
    gf = jnp.sum(h, axis=0, keepdims=True) / jnp.maximum(num_nodes, 1)
    return gf @ params["wp"] + params["bp"]                            # [1, n_tasks]


# ---------------------------------------------------------------------------
if __name__ == "__main__":
    key = jax.random.PRNGKey(0)
    k_params, k_graphs = jax.random.split(key)
    params = init_params(k_params)

    G = 4
    node_counts = [16, 11, 20, 7]          # true node counts (runtime, bucketed)
    edge_counts = [32, 20, 40, 12]         # true edge counts (runtime, bucketed)

    gkeys = jax.random.split(k_graphs, G)
    src_l, dst_l, x_l, w_l = [], [], [], []
    for g in range(G):
        k1, k2, k3, k4, k5, k6 = jax.random.split(gkeys[g], 6)
        n = node_counts[g]
        src_l.append(jax.random.randint(k1, (EDGE_PAD,), 0, n, dtype=jnp.int32))
        dst_l.append(jax.random.randint(k2, (EDGE_PAD,), 0, n, dtype=jnp.int32))
        x_l.append(jnp.stack(
            [jax.random.randint(k3, (NODE_PAD,), 0, NUM_NODE_EMB_LIST[0], dtype=jnp.int32),
             jax.random.randint(k4, (NODE_PAD,), 0, NUM_NODE_EMB_LIST[1], dtype=jnp.int32)],
            axis=-1))
        w_l.append(jnp.stack(
            [jax.random.randint(k5, (EDGE_PAD,), 0, NUM_EDGE_EMB_LIST[0], dtype=jnp.int32),
             jax.random.randint(k6, (EDGE_PAD,), 0, NUM_EDGE_EMB_LIST[1], dtype=jnp.int32)],
            axis=-1))
    src_b = jnp.stack(src_l)
    dst_b = jnp.stack(dst_l)
    x_b = jnp.stack(x_l)
    w_b = jnp.stack(w_l)
    n_nodes = jnp.array(node_counts, jnp.int32)
    n_edges = jnp.array(edge_counts, jnp.int32)

    out = gine_forward_jit(params, src_b, dst_b, x_b, w_b, n_nodes, n_edges)
    out = jax.block_until_ready(out)
    assert out.shape == (G, N_TASKS) and out.dtype == jnp.float32
    assert bool(jnp.all(jnp.isfinite(out)))

    ref = jnp.stack([gine_reference(params, src_b[g], dst_b[g], x_b[g], w_b[g],
                                    node_counts[g], edge_counts[g])[0]
                     for g in range(G)])
    max_err = float(jnp.max(jnp.abs(out - ref)))
    assert max_err < 0.1, f"mismatch vs f32 reference: max_err={max_err}"
    print("KERNEL_OK")
</pallas_src>

<mosaic_0001>
module attributes {stable_mosaic.version = 11 : i64} {
  func.func private @main(%arg0: i32) attributes {dimension_semantics = [#tpu.dimension_semantics<core_parallel>], iteration_bounds = array<i64: 2>, tpu.core_type = #tpu.core_type<sc_scalar_subcore>, window_params = []} {
    return
  }
}

module attributes {stable_mosaic.version = 11 : i64} {
  func.func private @main(%arg0: i32) attributes {dimension_semantics = [#tpu.dimension_semantics<core_parallel>], iteration_bounds = array<i64: 2>, tpu.core_type = #tpu.core_type<sc_scalar_subcore>, window_params = []} {
    return
  }
}

module attributes {stable_mosaic.version = 11 : i64} {
  func.func @_gine_fused_kernel(%arg0: i32, %arg1: memref<4xi32, #tpu.memory_space<smem>>, %arg2: memref<1x128x128xbf16, #tpu.memory_space<vmem>>, %arg3: memref<1x128x128xf32, #tpu.memory_space<vmem>>, %arg4: memref<1x5x128x128xbf16, #tpu.memory_space<vmem>>, %arg5: memref<1x1x128xbf16, #tpu.memory_space<vmem>>, %arg6: memref<5x128x128xbf16, #tpu.memory_space<vmem>>, %arg7: memref<5x1x128xf32, #tpu.memory_space<vmem>>, %arg8: memref<5x128x128xbf16, #tpu.memory_space<vmem>>, %arg9: memref<5x1x128xf32, #tpu.memory_space<vmem>>, %arg10: memref<128x128xbf16, #tpu.memory_space<vmem>>, %arg11: memref<1x128xf32, #tpu.memory_space<vmem>>, %arg12: memref<1x1x128xf32, #tpu.memory_space<vmem>>) attributes {dimension_semantics = [#tpu.dimension_semantics<parallel>], iteration_bounds = array<i64: 4>, scalar_prefetch = 1 : i64, scratch_operands = 0 : i64, tpu.core_type = #tpu.core_type<tc>, window_params = [{transform_indices = @transform_0, window_bounds = array<i64: 1, 128, 128>}, {transform_indices = @transform_1, window_bounds = array<i64: 1, 128, 128>}, {transform_indices = @transform_2, window_bounds = array<i64: 1, 5, 128, 128>}, {transform_indices = @transform_3, window_bounds = array<i64: 1, 1, 128>}, {pipeline_mode = #tpu.pipeline_mode<synchronous>, transform_indices = @transform_4, window_bounds = array<i64: 5, 128, 128>}, {pipeline_mode = #tpu.pipeline_mode<synchronous>, transform_indices = @transform_5, window_bounds = array<i64: 5, 1, 128>}, {pipeline_mode = #tpu.pipeline_mode<synchronous>, transform_indices = @transform_6, window_bounds = array<i64: 5, 128, 128>}, {pipeline_mode = #tpu.pipeline_mode<synchronous>, transform_indices = @transform_7, window_bounds = array<i64: 5, 1, 128>}, {pipeline_mode = #tpu.pipeline_mode<synchronous>, transform_indices = @transform_8, window_bounds = array<i64: 128, 128>}, {pipeline_mode = #tpu.pipeline_mode<synchronous>, transform_indices = @transform_9, window_bounds = array<i64: 1, 128>}, {transform_indices = @transform_10, window_bounds = array<i64: 1, 1, 128>}]} {
    %c0 = arith.constant 0 : index
    %c0_0 = arith.constant 0 : index
    %c0_1 = arith.constant 0 : index
    %0 = vector.load %arg2[%c0, %c0_0, %c0_1] : memref<1x128x128xbf16, #tpu.memory_space<vmem>>, vector<1x128x128xbf16>
    %1 = vector.shape_cast %0 : vector<1x128x128xbf16> to vector<128x128xbf16>
    %c0_2 = arith.constant 0 : index
    %c0_3 = arith.constant 0 : index
    %c0_4 = arith.constant 0 : index
    %2 = vector.load %arg3[%c0_2, %c0_3, %c0_4] : memref<1x128x128xf32, #tpu.memory_space<vmem>>, vector<1x128x128xf32>
    %3 = vector.shape_cast %2 : vector<1x128x128xf32> to vector<128x128xf32>
    %4 = arith.truncf %3 : vector<128x128xf32> to vector<128x128xbf16>
    %cst = arith.constant dense<0.000000e+00> : vector<128x128xf32>
    %5 = tpu.matmul %1, %4, %cst {dimension_numbers = #tpu.dot_dimension_numbers<[1], [0], [0], [1], [0, 0, 1, 1], [], []>} : vector<128x128xbf16>, vector<128x128xbf16>, vector<128x128xf32> -> vector<128x128xf32>
    %c0_5 = arith.constant 0 : index
    %c0_6 = arith.constant 0 : index
    %c0_7 = arith.constant 0 : index
    %c0_8 = arith.constant 0 : index
    %6 = vector.load %arg4[%c0_5, %c0_6, %c0_7, %c0_8] : memref<1x5x128x128xbf16, #tpu.memory_space<vmem>>, vector<1x1x128x128xbf16>
    %7 = vector.shape_cast %6 : vector<1x1x128x128xbf16> to vector<128x128xbf16>
    %8 = arith.extf %7 : vector<128x128xbf16> to vector<128x128xf32>
    %9 = arith.addf %5, %8 : vector<128x128xf32>
    %10 = arith.truncf %9 : vector<128x128xf32> to vector<128x128xbf16>
    %c0_9 = arith.constant 0 : index
    %c0_10 = arith.constant 0 : index
    %c0_11 = arith.constant 0 : index
    %11 = vector.load %arg6[%c0_9, %c0_10, %c0_11] : memref<5x128x128xbf16, #tpu.memory_space<vmem>>, vector<1x128x128xbf16>
    %12 = vector.shape_cast %11 : vector<1x128x128xbf16> to vector<128x128xbf16>
    %cst_12 = arith.constant dense<0.000000e+00> : vector<128x128xf32>
    %13 = tpu.matmul %10, %12, %cst_12 {dimension_numbers = #tpu.dot_dimension_numbers<[1], [0], [0], [1], [0, 0, 1, 1], [], []>} : vector<128x128xbf16>, vector<128x128xbf16>, vector<128x128xf32> -> vector<128x128xf32>
    %c0_13 = arith.constant 0 : index
    %c0_14 = arith.constant 0 : index
    %c0_15 = arith.constant 0 : index
    %14 = vector.load %arg7[%c0_13, %c0_14, %c0_15] : memref<5x1x128xf32, #tpu.memory_space<vmem>>, vector<1x1x128xf32>
    %15 = vector.shape_cast %14 : vector<1x1x128xf32> to vector<1x128xf32>
    %16 = vector.broadcast %15 : vector<1x128xf32> to vector<128x128xf32>
    %17 = arith.addf %13, %16 : vector<128x128xf32>
    %cst_16 = arith.constant 0.000000e+00 : f32
    %18 = vector.broadcast %cst_16 : f32 to vector<128x128xf32>
    %19 = arith.maximumf %17, %18 : vector<128x128xf32>
    %20 = arith.truncf %19 : vector<128x128xf32> to vector<128x128xbf16>
    %c0_17 = arith.constant 0 : index
    %c0_18 = arith.constant 0 : index
    %c0_19 = arith.constant 0 : index
    %21 = vector.load %arg8[%c0_17, %c0_18, %c0_19] : memref<5x128x128xbf16, #tpu.memory_space<vmem>>, vector<1x128x128xbf16>
    %22 = vector.shape_cast %21 : vector<1x128x128xbf16> to vector<128x128xbf16>
    %cst_20 = arith.constant dense<0.000000e+00> : vector<128x128xf32>
    %23 = tpu.matmul %20, %22, %cst_20 {dimension_numbers = #tpu.dot_dimension_numbers<[1], [0], [0], [1], [0, 0, 1, 1], [], []>} : vector<128x128xbf16>, vector<128x128xbf16>, vector<128x128xf32> -> vector<128x128xf32>
    %c0_21 = arith.constant 0 : index
    %c0_22 = arith.constant 0 : index
    %c0_23 = arith.constant 0 : index
    %24 = vector.load %arg9[%c0_21, %c0_22, %c0_23] : memref<5x1x128xf32, #tpu.memory_space<vmem>>, vector<1x1x128xf32>
    %25 = vector.shape_cast %24 : vector<1x1x128xf32> to vector<1x128xf32>
    %26 = vector.broadcast %25 : vector<1x128xf32> to vector<128x128xf32>
    %27 = arith.addf %23, %26 : vector<128x128xf32>
    %cst_24 = arith.constant 0.000000e+00 : f32
    %28 = vector.broadcast %cst_24 : f32 to vector<128x128xf32>
    %29 = arith.maximumf %27, %28 : vector<128x128xf32>
    %30 = arith.truncf %29 : vector<128x128xf32> to vector<128x128xbf16>
    %cst_25 = arith.constant dense<0.000000e+00> : vector<128x128xf32>
    %31 = tpu.matmul %1, %30, %cst_25 {dimension_numbers = #tpu.dot_dimension_numbers<[1], [0], [0], [1], [0, 0, 1, 1], [], []>} : vector<128x128xbf16>, vector<128x128xbf16>, vector<128x128xf32> -> vector<128x128xf32>
    %c0_26 = arith.constant 0 : index
    %c1 = arith.constant 1 : index
    %c0_27 = arith.constant 0 : index
    %c0_28 = arith.constant 0 : index
    %32 = vector.load %arg4[%c0_26, %c1, %c0_27, %c0_28] : memref<1x5x128x128xbf16, #tpu.memory_space<vmem>>, vector<1x1x128x128xbf16>
    %33 = vector.shape_cast %32 : vector<1x1x128x128xbf16> to vector<128x128xbf16>
    %34 = arith.extf %33 : vector<128x128xbf16> to vector<128x128xf32>
    %35 = arith.addf %31, %34 : vector<128x128xf32>
    %36 = arith.truncf %35 : vector<128x128xf32> to vector<128x128xbf16>
    %c1_29 = arith.constant 1 : index
    %c0_30 = arith.constant 0 : index
    %c0_31 = arith.constant 0 : index
    %37 = vector.load %arg6[%c1_29, %c0_30, %c0_31] : memref<5x128x128xbf16, #tpu.memory_space<vmem>>, vector<1x128x128xbf16>
    %38 = vector.shape_cast %37 : vector<1x128x128xbf16> to vector<128x128xbf16>
    %cst_32 = arith.constant dense<0.000000e+00> : vector<128x128xf32>
    %39 = tpu.matmul %36, %38, %cst_32 {dimension_numbers = #tpu.dot_dimension_numbers<[1], [0], [0], [1], [0, 0, 1, 1], [], []>} : vector<128x128xbf16>, vector<128x128xbf16>, vector<128x128xf32> -> vector<128x128xf32>
    %c1_33 = arith.constant 1 : index
    %c0_34 = arith.constant 0 : index
    %c0_35 = arith.constant 0 : index
    %40 = vector.load %arg7[%c1_33, %c0_34, %c0_35] : memref<5x1x128xf32, #tpu.memory_space<vmem>>, vector<1x1x128xf32>
    %41 = vector.shape_cast %40 : vector<1x1x128xf32> to vector<1x128xf32>
    %42 = vector.broadcast %41 : vector<1x128xf32> to vector<128x128xf32>
    %43 = arith.addf %39, %42 : vector<128x128xf32>
    %cst_36 = arith.constant 0.000000e+00 : f32
    %44 = vector.broadcast %cst_36 : f32 to vector<128x128xf32>
    %45 = arith.maximumf %43, %44 : vector<128x128xf32>
    %46 = arith.truncf %45 : vector<128x128xf32> to vector<128x128xbf16>
    %c1_37 = arith.constant 1 : index
    %c0_38 = arith.constant 0 : index
    %c0_39 = arith.constant 0 : index
    %47 = vector.load %arg8[%c1_37, %c0_38, %c0_39] : memref<5x128x128xbf16, #tpu.memory_space<vmem>>, vector<1x128x128xbf16>
    %48 = vector.shape_cast %47 : vector<1x128x128xbf16> to vector<128x128xbf16>
    %cst_40 = arith.constant dense<0.000000e+00> : vector<128x128xf32>
    %49 = tpu.matmul %46, %48, %cst_40 {dimension_numbers = #tpu.dot_dimension_numbers<[1], [0], [0], [1], [0, 0, 1, 1], [], []>} : vector<128x128xbf16>, vector<128x128xbf16>, vector<128x128xf32> -> vector<128x128xf32>
    %c1_41 = arith.constant 1 : index
    %c0_42 = arith.constant 0 : index
    %c0_43 = arith.constant 0 : index
    %50 = vector.load %arg9[%c1_41, %c0_42, %c0_43] : memref<5x1x128xf32, #tpu.memory_space<vmem>>, vector<1x1x128xf32>
    %51 = vector.shape_cast %50 : vector<1x1x128xf32> to vector<1x128xf32>
    %52 = vector.broadcast %51 : vector<1x128xf32> to vector<128x128xf32>
    %53 = arith.addf %49, %52 : vector<128x128xf32>
    %cst_44 = arith.constant 0.000000e+00 : f32
    %54 = vector.broadcast %cst_44 : f32 to vector<128x128xf32>
    %55 = arith.maximumf %53, %54 : vector<128x128xf32>
    %56 = arith.truncf %55 : vector<128x128xf32> to vector<128x128xbf16>
    %cst_45 = arith.constant dense<0.000000e+00> : vector<128x128xf32>
    %57 = tpu.matmul %1, %56, %cst_45 {dimension_numbers = #tpu.dot_dimension_numbers<[1], [0], [0], [1], [0, 0, 1, 1], [], []>} : vector<128x128xbf16>, vector<128x128xbf16>, vector<128x128xf32> -> vector<128x128xf32>
    %c0_46 = arith.constant 0 : index
    %c2 = arith.constant 2 : index
    %c0_47 = arith.constant 0 : index
    %c0_48 = arith.constant 0 : index
    %58 = vector.load %arg4[%c0_46, %c2, %c0_47, %c0_48] : memref<1x5x128x128xbf16, #tpu.memory_space<vmem>>, vector<1x1x128x128xbf16>
    %59 = vector.shape_cast %58 : vector<1x1x128x128xbf16> to vector<128x128xbf16>
    %60 = arith.extf %59 : vector<128x128xbf16> to vector<128x128xf32>
    %61 = arith.addf %57, %60 : vector<128x128xf32>
    %62 = arith.truncf %61 : vector<128x128xf32> to vector<128x128xbf16>
    %c2_49 = arith.constant 2 : index
    %c0_50 = arith.constant 0 : index
    %c0_51 = arith.constant 0 : index
    %63 = vector.load %arg6[%c2_49, %c0_50, %c0_51] : memref<5x128x128xbf16, #tpu.memory_space<vmem>>, vector<1x128x128xbf16>
    %64 = vector.shape_cast %63 : vector<1x128x128xbf16> to vector<128x128xbf16>
    %cst_52 = arith.constant dense<0.000000e+00> : vector<128x128xf32>
    %65 = tpu.matmul %62, %64, %cst_52 {dimension_numbers = #tpu.dot_dimension_numbers<[1], [0], [0], [1], [0, 0, 1, 1], [], []>} : vector<128x128xbf16>, vector<128x128xbf16>, vector<128x128xf32> -> vector<128x128xf32>
    %c2_53 = arith.constant 2 : index
    %c0_54 = arith.constant 0 : index
    %c0_55 = arith.constant 0 : index
    %66 = vector.load %arg7[%c2_53, %c0_54, %c0_55] : memref<5x1x128xf32, #tpu.memory_space<vmem>>, vector<1x1x128xf32>
    %67 = vector.shape_cast %66 : vector<1x1x128xf32> to vector<1x128xf32>
    %68 = vector.broadcast %67 : vector<1x128xf32> to vector<128x128xf32>
    %69 = arith.addf %65, %68 : vector<128x128xf32>
    %cst_56 = arith.constant 0.000000e+00 : f32
    %70 = vector.broadcast %cst_56 : f32 to vector<128x128xf32>
    %71 = arith.maximumf %69, %70 : vector<128x128xf32>
    %72 = arith.truncf %71 : vector<128x128xf32> to vector<128x128xbf16>
    %c2_57 = arith.constant 2 : index
    %c0_58 = arith.constant 0 : index
    %c0_59 = arith.constant 0 : index
    %73 = vector.load %arg8[%c2_57, %c0_58, %c0_59] : memref<5x128x128xbf16, #tpu.memory_space<vmem>>, vector<1x128x128xbf16>
    %74 = vector.shape_cast %73 : vector<1x128x128xbf16> to vector<128x128xbf16>
    %cst_60 = arith.constant dense<0.000000e+00> : vector<128x128xf32>
    %75 = tpu.matmul %72, %74, %cst_60 {dimension_numbers = #tpu.dot_dimension_numbers<[1], [0], [0], [1], [0, 0, 1, 1], [], []>} : vector<128x128xbf16>, vector<128x128xbf16>, vector<128x128xf32> -> vector<128x128xf32>
    %c2_61 = arith.constant 2 : index
    %c0_62 = arith.constant 0 : index
    %c0_63 = arith.constant 0 : index
    %76 = vector.load %arg9[%c2_61, %c0_62, %c0_63] : memref<5x1x128xf32, #tpu.memory_space<vmem>>, vector<1x1x128xf32>
    %77 = vector.shape_cast %76 : vector<1x1x128xf32> to vector<1x128xf32>
    %78 = vector.broadcast %77 : vector<1x128xf32> to vector<128x128xf32>
    %79 = arith.addf %75, %78 : vector<128x128xf32>
    %cst_64 = arith.constant 0.000000e+00 : f32
    %80 = vector.broadcast %cst_64 : f32 to vector<128x128xf32>
    %81 = arith.maximumf %79, %80 : vector<128x128xf32>
    %82 = arith.truncf %81 : vector<128x128xf32> to vector<128x128xbf16>
    %cst_65 = arith.constant dense<0.000000e+00> : vector<128x128xf32>
    %83 = tpu.matmul %1, %82, %cst_65 {dimension_numbers = #tpu.dot_dimension_numbers<[1], [0], [0], [1], [0, 0, 1, 1], [], []>} : vector<128x128xbf16>, vector<128x128xbf16>, vector<128x128xf32> -> vector<128x128xf32>
    %c0_66 = arith.constant 0 : index
    %c3 = arith.constant 3 : index
    %c0_67 = arith.constant 0 : index
    %c0_68 = arith.constant 0 : index
    %84 = vector.load %arg4[%c0_66, %c3, %c0_67, %c0_68] : memref<1x5x128x128xbf16, #tpu.memory_space<vmem>>, vector<1x1x128x128xbf16>
    %85 = vector.shape_cast %84 : vector<1x1x128x128xbf16> to vector<128x128xbf16>
    %86 = arith.extf %85 : vector<128x128xbf16> to vector<128x128xf32>
    %87 = arith.addf %83, %86 : vector<128x128xf32>
    %88 = arith.truncf %87 : vector<128x128xf32> to vector<128x128xbf16>
    %c3_69 = arith.constant 3 : index
    %c0_70 = arith.constant 0 : index
    %c0_71 = arith.constant 0 : index
    %89 = vector.load %arg6[%c3_69, %c0_70, %c0_71] : memref<5x128x128xbf16, #tpu.memory_space<vmem>>, vector<1x128x128xbf16>
    %90 = vector.shape_cast %89 : vector<1x128x128xbf16> to vector<128x128xbf16>
    %cst_72 = arith.constant dense<0.000000e+00> : vector<128x128xf32>
    %91 = tpu.matmul %88, %90, %cst_72 {dimension_numbers = #tpu.dot_dimension_numbers<[1], [0], [0], [1], [0, 0, 1, 1], [], []>} : vector<128x128xbf16>, vector<128x128xbf16>, vector<128x128xf32> -> vector<128x128xf32>
    %c3_73 = arith.constant 3 : index
    %c0_74 = arith.constant 0 : index
    %c0_75 = arith.constant 0 : index
    %92 = vector.load %arg7[%c3_73, %c0_74, %c0_75] : memref<5x1x128xf32, #tpu.memory_space<vmem>>, vector<1x1x128xf32>
    %93 = vector.shape_cast %92 : vector<1x1x128xf32> to vector<1x128xf32>
    %94 = vector.broadcast %93 : vector<1x128xf32> to vector<128x128xf32>
    %95 = arith.addf %91, %94 : vector<128x128xf32>
    %cst_76 = arith.constant 0.000000e+00 : f32
    %96 = vector.broadcast %cst_76 : f32 to vector<128x128xf32>
    %97 = arith.maximumf %95, %96 : vector<128x128xf32>
    %98 = arith.truncf %97 : vector<128x128xf32> to vector<128x128xbf16>
    %c3_77 = arith.constant 3 : index
    %c0_78 = arith.constant 0 : index
    %c0_79 = arith.constant 0 : index
    %99 = vector.load %arg8[%c3_77, %c0_78, %c0_79] : memref<5x128x128xbf16, #tpu.memory_space<vmem>>, vector<1x128x128xbf16>
    %100 = vector.shape_cast %99 : vector<1x128x128xbf16> to vector<128x128xbf16>
    %cst_80 = arith.constant dense<0.000000e+00> : vector<128x128xf32>
    %101 = tpu.matmul %98, %100, %cst_80 {dimension_numbers = #tpu.dot_dimension_numbers<[1], [0], [0], [1], [0, 0, 1, 1], [], []>} : vector<128x128xbf16>, vector<128x128xbf16>, vector<128x128xf32> -> vector<128x128xf32>
    %c3_81 = arith.constant 3 : index
    %c0_82 = arith.constant 0 : index
    %c0_83 = arith.constant 0 : index
    %102 = vector.load %arg9[%c3_81, %c0_82, %c0_83] : memref<5x1x128xf32, #tpu.memory_space<vmem>>, vector<1x1x128xf32>
    %103 = vector.shape_cast %102 : vector<1x1x128xf32> to vector<1x128xf32>
    %104 = vector.broadcast %103 : vector<1x128xf32> to vector<128x128xf32>
    %105 = arith.addf %101, %104 : vector<128x128xf32>
    %cst_84 = arith.constant 0.000000e+00 : f32
    %106 = vector.broadcast %cst_84 : f32 to vector<128x128xf32>
    %107 = arith.maximumf %105, %106 : vector<128x128xf32>
    %108 = arith.truncf %107 : vector<128x128xf32> to vector<128x128xbf16>
    %cst_85 = arith.constant dense<0.000000e+00> : vector<128x128xf32>
    %109 = tpu.matmul %1, %108, %cst_85 {dimension_numbers = #tpu.dot_dimension_numbers<[1], [0], [0], [1], [0, 0, 1, 1], [], []>} : vector<128x128xbf16>, vector<128x128xbf16>, vector<128x128xf32> -> vector<128x128xf32>
    %c0_86 = arith.constant 0 : index
    %c4 = arith.constant 4 : index
    %c0_87 = arith.constant 0 : index
    %c0_88 = arith.constant 0 : index
    %110 = vector.load %arg4[%c0_86, %c4, %c0_87, %c0_88] : memref<1x5x128x128xbf16, #tpu.memory_space<vmem>>, vector<1x1x128x128xbf16>
    %111 = vector.shape_cast %110 : vector<1x1x128x128xbf16> to vector<128x128xbf16>
    %112 = arith.extf %111 : vector<128x128xbf16> to vector<128x128xf32>
    %113 = arith.addf %109, %112 : vector<128x128xf32>
    %114 = arith.truncf %113 : vector<128x128xf32> to vector<128x128xbf16>
    %c4_89 = arith.constant 4 : index
    %c0_90 = arith.constant 0 : index
    %c0_91 = arith.constant 0 : index
    %115 = vector.load %arg6[%c4_89, %c0_90, %c0_91] : memref<5x128x128xbf16, #tpu.memory_space<vmem>>, vector<1x128x128xbf16>
    %116 = vector.shape_cast %115 : vector<1x128x128xbf16> to vector<128x128xbf16>
    %cst_92 = arith.constant dense<0.000000e+00> : vector<128x128xf32>
    %117 = tpu.matmul %114, %116, %cst_92 {dimension_numbers = #tpu.dot_dimension_numbers<[1], [0], [0], [1], [0, 0, 1, 1], [], []>} : vector<128x128xbf16>, vector<128x128xbf16>, vector<128x128xf32> -> vector<128x128xf32>
    %c4_93 = arith.constant 4 : index
    %c0_94 = arith.constant 0 : index
    %c0_95 = arith.constant 0 : index
    %118 = vector.load %arg7[%c4_93, %c0_94, %c0_95] : memref<5x1x128xf32, #tpu.memory_space<vmem>>, vector<1x1x128xf32>
    %119 = vector.shape_cast %118 : vector<1x1x128xf32> to vector<1x128xf32>
    %120 = vector.broadcast %119 : vector<1x128xf32> to vector<128x128xf32>
    %121 = arith.addf %117, %120 : vector<128x128xf32>
    %cst_96 = arith.constant 0.000000e+00 : f32
    %122 = vector.broadcast %cst_96 : f32 to vector<128x128xf32>
    %123 = arith.maximumf %121, %122 : vector<128x128xf32>
    %124 = arith.truncf %123 : vector<128x128xf32> to vector<128x128xbf16>
    %c4_97 = arith.constant 4 : index
    %c0_98 = arith.constant 0 : index
    %c0_99 = arith.constant 0 : index
    %125 = vector.load %arg8[%c4_97, %c0_98, %c0_99] : memref<5x128x128xbf16, #tpu.memory_space<vmem>>, vector<1x128x128xbf16>
    %126 = vector.shape_cast %125 : vector<1x128x128xbf16> to vector<128x128xbf16>
    %cst_100 = arith.constant dense<0.000000e+00> : vector<128x128xf32>
    %127 = tpu.matmul %124, %126, %cst_100 {dimension_numbers = #tpu.dot_dimension_numbers<[1], [0], [0], [1], [0, 0, 1, 1], [], []>} : vector<128x128xbf16>, vector<128x128xbf16>, vector<128x128xf32> -> vector<128x128xf32>
    %c4_101 = arith.constant 4 : index
    %c0_102 = arith.constant 0 : index
    %c0_103 = arith.constant 0 : index
    %128 = vector.load %arg9[%c4_101, %c0_102, %c0_103] : memref<5x1x128xf32, #tpu.memory_space<vmem>>, vector<1x1x128xf32>
    %129 = vector.shape_cast %128 : vector<1x1x128xf32> to vector<1x128xf32>
    %130 = vector.broadcast %129 : vector<1x128xf32> to vector<128x128xf32>
    %131 = arith.addf %127, %130 : vector<128x128xf32>
    %132 = arith.index_cast %arg0 : i32 to index
    %133 = memref.load %arg1[%132] : memref<4xi32, #tpu.memory_space<smem>>
    %c1_i32 = arith.constant 1 : i32
    %134 = arith.maxsi %133, %c1_i32 : i32
    %135 = arith.sitofp %134 : i32 to f32
    %c0_104 = arith.constant 0 : index
    %c0_105 = arith.constant 0 : index
    %c0_106 = arith.constant 0 : index
    %136 = vector.load %arg5[%c0_104, %c0_105, %c0_106] : memref<1x1x128xbf16, #tpu.memory_space<vmem>>, vector<1x1x128xbf16>
    %137 = vector.shape_cast %136 : vector<1x1x128xbf16> to vector<1x128xbf16>
    %138 = arith.truncf %131 : vector<128x128xf32> to vector<128x128xbf16>
    %cst_107 = arith.constant dense<0.000000e+00> : vector<1x128xf32>
    %139 = tpu.matmul %137, %138, %cst_107 {dimension_numbers = #tpu.dot_dimension_numbers<[1], [0], [0], [1], [0, 0, 1, 1], [], []>} : vector<1x128xbf16>, vector<128x128xbf16>, vector<1x128xf32> -> vector<1x128xf32>
    %cst_108 = arith.constant 1.000000e+00 : f32
    %140 = arith.divf %cst_108, %135 : f32
    %141 = vector.broadcast %140 : f32 to vector<1x128xf32>
    %142 = arith.mulf %139, %141 : vector<1x128xf32>
    %143 = arith.truncf %142 : vector<1x128xf32> to vector<1x128xbf16>
    %c0_109 = arith.constant 0 : index
    %c0_110 = arith.constant 0 : index
    %144 = vector.load %arg10[%c0_109, %c0_110] : memref<128x128xbf16, #tpu.memory_space<vmem>>, vector<128x128xbf16>
    %cst_111 = arith.constant dense<0.000000e+00> : vector<1x128xf32>
    %145 = tpu.matmul %143, %144, %cst_111 {dimension_numbers = #tpu.dot_dimension_numbers<[1], [0], [0], [1], [0, 0, 1, 1], [], []>} : vector<1x128xbf16>, vector<128x128xbf16>, vector<1x128xf32> -> vector<1x128xf32>
    %c0_112 = arith.constant 0 : index
    %c0_113 = arith.constant 0 : index
    %146 = vector.load %arg11[%c0_112, %c0_113] : memref<1x128xf32, #tpu.memory_space<vmem>>, vector<1x128xf32>
    %147 = arith.addf %145, %146 : vector<1x128xf32>
    %c0_114 = arith.constant 0 : index
    %c0_115 = arith.constant 0 : index
    %c0_116 = arith.constant 0 : index
    %148 = vector.load %arg12[%c0_114, %c0_115, %c0_116] : memref<1x1x128xf32, #tpu.memory_space<vmem>>, vector<1x1x128xf32>
    %149 = vector.shape_cast %148 : vector<1x1x128xf32> to vector<1x128xf32>
    %150 = vector.shape_cast %147 : vector<1x128xf32> to vector<1x1x128xf32>
    tpu.vector_store %arg12[%c0_114, %c0_115, %c0_116], %150 {strides = array<i32>} : memref<1x1x128xf32, #tpu.memory_space<vmem>>, vector<1x1x128xf32>,
    return
  }
  func.func @transform_0(%arg0: i32, %arg1: memref<4xi32, #tpu.memory_space<smem>>) -> (i32, i32, i32) {
    %c0_i32 = arith.constant 0 : i32
    %c0_i32_0 = arith.constant 0 : i32
    %c0_i32_1 = arith.constant 0 : i32
    return %arg0, %c0_i32, %c0_i32_0 : i32, i32, i32
  }
  func.func @transform_1(%arg0: i32, %arg1: memref<4xi32, #tpu.memory_space<smem>>) -> (i32, i32, i32) {
    %c0_i32 = arith.constant 0 : i32
    %c0_i32_0 = arith.constant 0 : i32
    %c0_i32_1 = arith.constant 0 : i32
    return %arg0, %c0_i32, %c0_i32_0 : i32, i32, i32
  }
  func.func @transform_2(%arg0: i32, %arg1: memref<4xi32, #tpu.memory_space<smem>>) -> (i32, i32, i32, i32) {
    %c0_i32 = arith.constant 0 : i32
    %c0_i32_0 = arith.constant 0 : i32
    %c0_i32_1 = arith.constant 0 : i32
    %c0_i32_2 = arith.constant 0 : i32
    return %arg0, %c0_i32, %c0_i32_0, %c0_i32_1 : i32, i32, i32, i32
  }
  func.func @transform_3(%arg0: i32, %arg1: memref<4xi32, #tpu.memory_space<smem>>) -> (i32, i32, i32) {
    %c0_i32 = arith.constant 0 : i32
    %c0_i32_0 = arith.constant 0 : i32
    %c0_i32_1 = arith.constant 0 : i32
    return %arg0, %c0_i32, %c0_i32_0 : i32, i32, i32
  }
  func.func @transform_4(%arg0: i32, %arg1: memref<4xi32, #tpu.memory_space<smem>>) -> (i32, i32, i32) {
    %c0_i32 = arith.constant 0 : i32
    %c0_i32_0 = arith.constant 0 : i32
    %c0_i32_1 = arith.constant 0 : i32
    %c0_i32_2 = arith.constant 0 : i32
    return %c0_i32, %c0_i32_0, %c0_i32_1 : i32, i32, i32
  }
  func.func @transform_5(%arg0: i32, %arg1: memref<4xi32, #tpu.memory_space<smem>>) -> (i32, i32, i32) {
    %c0_i32 = arith.constant 0 : i32
    %c0_i32_0 = arith.constant 0 : i32
    %c0_i32_1 = arith.constant 0 : i32
    %c0_i32_2 = arith.constant 0 : i32
    return %c0_i32, %c0_i32_0, %c0_i32_1 : i32, i32, i32
  }
  func.func @transform_6(%arg0: i32, %arg1: memref<4xi32, #tpu.memory_space<smem>>) -> (i32, i32, i32) {
    %c0_i32 = arith.constant 0 : i32
    %c0_i32_0 = arith.constant 0 : i32
    %c0_i32_1 = arith.constant 0 : i32
    %c0_i32_2 = arith.constant 0 : i32
    return %c0_i32, %c0_i32_0, %c0_i32_1 : i32, i32, i32
  }
  func.func @transform_7(%arg0: i32, %arg1: memref<4xi32, #tpu.memory_space<smem>>) -> (i32, i32, i32) {
    %c0_i32 = arith.constant 0 : i32
    %c0_i32_0 = arith.constant 0 : i32
    %c0_i32_1 = arith.constant 0 : i32
    %c0_i32_2 = arith.constant 0 : i32
    return %c0_i32, %c0_i32_0, %c0_i32_1 : i32, i32, i32
  }
  func.func @transform_8(%arg0: i32, %arg1: memref<4xi32, #tpu.memory_space<smem>>) -> (i32, i32) {
    %c0_i32 = arith.constant 0 : i32
    %c0_i32_0 = arith.constant 0 : i32
    %c0_i32_1 = arith.constant 0 : i32
    return %c0_i32, %c0_i32_0 : i32, i32
  }
  func.func @transform_9(%arg0: i32, %arg1: memref<4xi32, #tpu.memory_space<smem>>) -> (i32, i32) {
    %c0_i32 = arith.constant 0 : i32
    %c0_i32_0 = arith.constant 0 : i32
    %c0_i32_1 = arith.constant 0 : i32
    return %c0_i32, %c0_i32_0 : i32, i32
  }
  func.func @transform_10(%arg0: i32, %arg1: memref<4xi32, #tpu.memory_space<smem>>) -> (i32, i32, i32) {
    %c0_i32 = arith.constant 0 : i32
    %c0_i32_0 = arith.constant 0 : i32
    %c0_i32_1 = arith.constant 0 : i32
    return %arg0, %c0_i32, %c0_i32_0 : i32, i32, i32
  }
}

</mosaic_0001>

<bundles_post_ra>
// kernel: gine_forward.1
= control target key start
LH: loop header
LB: loop body
LE: loop exit
PB: predicated region body
PF: predicated region fallthrough
CT: control target
= control target key end

     0   :  { %s5368_s0 = inlined_call_operand.vmem [shape: s32[4], index: 0, kind: input, shape index: {}]   ;;  %s5369_s1 = inlined_call_operand.vmem [shape: bf16[4,128,128], index: 1, kind: input, shape index: {}]   ;;  %s5370_s2 = inlined_call_operand.vmem [shape: f32[4,128,128], index: 2, kind: input, shape index: {}]   ;;  %s5371_s3 = inlined_call_operand.vmem [shape: bf16[4,5,128,128], index: 3, kind: input, shape index: {}]   ;;  %s5372_s4 = inlined_call_operand.vmem [shape: bf16[4,1,128], index: 4, kind: input, shape index: {}]   ;;  %s5373_s5 = inlined_call_operand.vmem [shape: bf16[5,128,128], index: 5, kind: input, shape index: {}]   ;;  %s5374_s6 = inlined_call_operand.vmem [shape: f32[5,1,128], index: 6, kind: input, shape index: {}]   ;;  %s5375_s7 = inlined_call_operand.vmem [shape: bf16[5,128,128], index: 7, kind: input, shape index: {}]   ;;  %s5376_s8 = inlined_call_operand.vmem [shape: f32[5,1,128], index: 8, kind: input, shape index: {}]   ;;  %s5377_s9 = inlined_call_operand.vmem [shape: bf16[128,128], index: 9, kind: input, shape index: {}]   ;;  %s5378_s10 = inlined_call_operand.vmem [shape: f32[1,128], index: 10, kind: input, shape index: {}]   ;;  %s5379_s11 = inlined_call_operand.vmem [shape: f32[4,1,128], index: 11, kind: output, shape index: {}]  }
   0x1   :  { %s16_s19 = sshll.u32 %s5368_s0, 4  ;;  %s17_s19 = int_to_ptr.vmem [resolvable:$true] %s16_s19 }
   0x2   :  { %s4777_s20 = scalar_lea.vmem %s17_s19, 16  ;;  %p4782_p1 = scmp.lt.s32.totalorder %s17_s19, %s17_s19 }
   0x3   :  { %p4778_p0 = scmp.ne.s32.totalorder %s17_s19, %s4777_s20  ;;  %p4783_p2 = scmp.lt.s32.totalorder %s4777_s20, %s4777_s20 }
   0x5   :  { %p4784_p3 = por %p4783_p2, %p4782_p1 }
   0x7   :  { %p4785_p4 = pnand %p4784_p3, %p4778_p0 }
   0x9   :  { %4788 = shalt.err (!%p4785_p4)  }
   0xa   :  { %s4799_s21 = smov [#allocation3]  }
   0xb   :  { %19 = dma.vmem_to_smem %s17_s19, 16, %s4799_s21, [#allocation2] }
   0xc   :  { %4793 = dma.done.wait [#allocation2], 16 }
   0xd   :  { %4794 = vsyncadd [#allocation2], 4294967280 }
   0xe   :  { %21 = sfence }
   0xf   :  { %s4865_s22 = smov 0  }
  0x10 LB: > { %s4871_s0 = sadd.s32 4294967295, %s4797_s22   ;;  %p3356_p5 = scmp.ge.s32.totalorder %s4797_s22, 1  ;;  %s4797_s22 = sphi %s4865_s22, %s27_s22  }
  0x11   : > { %p347_p6 = scmp.lt.s32.totalorder %s4797_s22, 5 }
  0x13   : > { %p348_p7 = pnand %p3356_p5, %p347_p6 }
  0x14   : > { %p396_p8 = scmp.lt.s32.totalorder (!%p348_p7), %s4871_s0, 3  ;;  %v4671_v0 = vld [vmem:[%s5373_s5] sm:$0xff] (!%p348_p7)   ;;  %v4672_v1 = vld [vmem:[%s5373_s5 + $0x8] sm:$0xff] (!%p348_p7)   ;;  %v4673_v2 = vld [vmem:[%s5373_s5 + $0x10] sm:$0xff] (!%p348_p7)   ;;  %vm4801_vm0 = vmmov (!%p348_p7), 0  }
  0x15   : > { %351 = sbr.rel (%p348_p7) target bundleno = 3970 (0xf82), region = 60  ;;  %4161 = vmatprep.subr.bf16.mxu1 (!%p348_p7), %v4671_v0  ;;  %v4674_v11 = vld [vmem:[%s5373_s5 + $0x18] sm:$0xff] (!%p348_p7)   ;;  %v4675_v13 = vld [vmem:[%s5373_s5 + $0x20] sm:$0xff] (!%p348_p7)   ;;  %v4676_v23 = vld [vmem:[%s5373_s5 + $0x28] sm:$0xff] (!%p348_p7)  }
  0x16   : > { %4162 = vmatpush3.bf16.msra.mxu1 (!%p348_p7), %v4671_v0  ;;  %v4677_v38 = vld [vmem:[%s5373_s5 + $0x30] sm:$0xff] (!%p348_p7)   ;;  %v4678_v39 = vld [vmem:[%s5373_s5 + $0x38] sm:$0xff] (!%p348_p7)   ;;  %v4679_v40 = vld [vmem:[%s5375_s7] sm:$0xff] (!%p348_p7)  }
  0x17   : > { %4163 = vmatprep.subr.bf16.mxu1 (!%p348_p7), %v4672_v1  ;;  %v4680_v41 = vld [vmem:[%s5375_s7 + $0x8] sm:$0xff] (!%p348_p7)   ;;  %v4681_v42 = vld [vmem:[%s5375_s7 + $0x10] sm:$0xff] (!%p348_p7)   ;;  %v4682_v43 = vld [vmem:[%s5375_s7 + $0x18] sm:$0xff] (!%p348_p7)  }
  0x18   : > { %v4683_v44 = vld [vmem:[%s5375_s7 + $0x20] sm:$0xff] (!%p348_p7)   ;;  %v4684_v45 = vld [vmem:[%s5375_s7 + $0x28] sm:$0xff] (!%p348_p7)  }
  0x1a   : > { %4164 = vmatpush3.bf16.msra.mxu1 (!%p348_p7), %v4672_v1 }
  0x1b   : > { %4165 = vmatprep.subr.bf16.mxu1 (!%p348_p7), %v4673_v2 }
  0x1c   : > { %s4883_s27 = scalar_select %p396_p8, %s4871_s0, 3 }
  0x1e   : > { %s3671_s28 = sshll.u32 %s4883_s27, 7  ;;  %s3670_s15 = sshll.u32 %s4883_s27, 6  ;;  %4166 = vmatpush3.bf16.msra.mxu1 %v4673_v2 }
  0x1f   : > { %s4892_s14 = scalar_lea.vmem %s5370_s2, %s3671_s28  ;;  %s4907_s20 = scalar_lea.vmem %s5369_s1, %s3670_s15  ;;  %4167 = vmatprep.subr.bf16.mxu1 %v4674_v11 }
  0x20   : > { %v434_v3 = vld [vmem:[%s4892_s14] sm:$0xff]  ;;  %v435_v4 = vld [vmem:[%s4892_s14 + $0x8] sm:$0xff]  ;;  %v436_v5 = vld [vmem:[%s4892_s14 + $0x10] sm:$0xff]  ;;  %s4649_s26 = smul.u32 320, %s4883_s27  ;;  %s3107_s28 = sld [smem:[#allocation3 + %s4871_s0]] }
  0x21   : > { %v450_v6 = vpack.c.bf16 %v435_v4, %v434_v3  ;;  %v437_v7 = vld [vmem:[%s4892_s14 + $0x18] sm:$0xff]  ;;  %v438_v9 = vld [vmem:[%s4892_s14 + $0x20] sm:$0xff]  ;;  %v439_v10 = vld [vmem:[%s4892_s14 + $0x28] sm:$0xff]  ;;  %s413_s12 = scalar_lea.vmem %s5372_s4, %s4883_s27  ;;  %s416_s18 = scalar_lea.vmem %s5379_s11, %s4883_s27 }
  0x22   : > { %v451_v8 = vpack.c.bf16 %v437_v7, %v436_v5  ;;  %v440_v12 = vld [vmem:[%s4892_s14 + $0x30] sm:$0xff]  ;;  %v452_v14 = vpack.c.bf16 %v439_v10, %v438_v9  ;;  %v441_v15 = vld [vmem:[%s4892_s14 + $0x38] sm:$0xff]  ;;  %v4915_v16 = vld [vmem:[%s4907_s20] sm:$0xff]   ;;  %4168 = vmatpush3.bf16.msra.mxu1 %v4674_v11  ;;  %s4985_s30 = scalar_lea.vmem %s5371_s3, %s4649_s26 }
  0x23   : > { %4129 = vmatprep.subr.bf16.mxu0 %v450_v6  ;;  %4145 = vmatprep.mubr.bf16.mxu0 %v4915_v16  ;;  %v453_v17 = vpack.c.bf16 %v441_v15, %v440_v12  ;;  %v442_v18 = vld [vmem:[%s4892_s14 + $0x40] sm:$0xff]  ;;  %v443_v19 = vld [vmem:[%s4892_s14 + $0x48] sm:$0xff]  ;;  %v444_v21 = vld [vmem:[%s4892_s14 + $0x50] sm:$0xff] }
  0x24   : > { %4130 = vmatpush3.bf16.msra.mxu0 %v450_v6  ;;  %4169 = vmatprep.subr.bf16.mxu1 %v4675_v13  ;;  %v454_v20 = vpack.c.bf16 %v443_v19, %v442_v18  ;;  %v445_v22 = vld [vmem:[%s4892_s14 + $0x58] sm:$0xff]  ;;  %v446_v24 = vld [vmem:[%s4892_s14 + $0x60] sm:$0xff]  ;;  %v447_v25 = vld [vmem:[%s4892_s14 + $0x68] sm:$0xff] }
  0x25   : > { %4131 = vmatprep.subr.bf16.mxu0 %v451_v8  ;;  %v455_v26 = vpack.c.bf16 %v445_v22, %v444_v21  ;;  %v448_v27 = vld [vmem:[%s4892_s14 + $0x70] sm:$0xff]  ;;  %v449_v28 = vld [vmem:[%s4892_s14 + $0x78] sm:$0xff]  ;;  %v456_v29 = vpack.c.bf16 %v447_v25, %v446_v24  ;;  %v4930_v31 = vld [vmem:[%s4907_s20 + $0x8] sm:$0xff]  }
  0x26   : > { %4170 = vmatpush3.bf16.msra.mxu1 %v4675_v13  ;;  %v457_v30 = vpack.c.bf16 %v449_v28, %v448_v27  ;;  %v4933_v32 = vld [vmem:[%s4907_s20 + $0x10] sm:$0xff]   ;;  %v4938_v33 = vld [vmem:[%s4907_s20 + $0x18] sm:$0xff]   ;;  %v4941_v34 = vld [vmem:[%s4907_s20 + $0x20] sm:$0xff]   ;;  %p3108_p9 = scmp.gt.s32.totalorder %s3107_s28, 1 }
  0x27   : > { %4171 = vmatprep.subr.bf16.mxu1 %v4676_v23  ;;  %v4946_v35 = vld [vmem:[%s4907_s20 + $0x28] sm:$0xff]   ;;  %v4949_v36 = vld [vmem:[%s4907_s20 + $0x30] sm:$0xff]   ;;  %v4954_v37 = vld [vmem:[%s4907_s20 + $0x38] sm:$0xff]  }
  0x28   : > { %4132 = vmatpush3.bf16.msra.mxu0 %v451_v8  ;;  %v3832_v46 = vld [vmem:[%s4985_s30 + $0x8] sm:$0xff]   ;;  %v3673_v47 = vld [vmem:[%s4985_s30] sm:$0xff]   ;;  %v3834_v60 = vld [vmem:[%s4985_s30 + $0x18] sm:$0xff]   ;;  %s5381_s28 = smov (!%p3108_p9, %s3107_s28), 1 }
  0x29   : > { %4133 = vmatprep.subr.bf16.mxu0 %v452_v14  ;;  %v3678_v48 = vunpack.c.l.bf16 %v3832_v46  ;;  %v3679_v49 = vunpack.c.h.bf16 %v3832_v46  ;;  %v3674_v51 = vunpack.c.l.bf16 %v3673_v47  ;;  %v3675_v52 = vunpack.c.h.bf16 %v3673_v47  ;;  %v3833_v62 = vld [vmem:[%s4985_s30 + $0x10] sm:$0xff]   ;;  %v3836_v12 = vld [vmem:[%s4985_s30 + $0x28] sm:$0xff]   ;;  %s3110_s0 = scvt.s32.f32 %s5381_s28 }
  0x2a   : > { %4172 = vmatpush3.bf16.msra.mxu1 %v4676_v23  ;;  %v3686_v0 = vunpack.c.l.bf16 %v3834_v60  ;;  %v3687_v1 = vunpack.c.h.bf16 %v3834_v60  ;;  %v3682_v3 = vunpack.c.l.bf16 %v3833_v62  ;;  %v3683_v4 = vunpack.c.h.bf16 %v3833_v62 }
  0x2b   : > { %4173 = vmatprep.subr.bf16.mxu1 %v4677_v38  ;;  %v3695_v18 = vunpack.c.h.bf16 %v3836_v12 }
  0x2c   : > { %4134 = vmatpush3.bf16.msra.mxu0 %v452_v14  ;;  %v3835_v14 = vld [vmem:[%s4985_s30 + $0x20] sm:$0xff]  }
  0x2d   : > { %4135 = vmatprep.subr.bf16.mxu0 %v453_v17  ;;  %v3691_v21 = vunpack.c.h.bf16 %v3835_v14 }
  0x2e   : > { %4174 = vmatpush3.bf16.msra.mxu1 %v4677_v38  ;;  %v3837_v38 = vld [vmem:[%s4985_s30 + $0x30] sm:$0xff]  }
  0x2f   : > { %4175 = vmatprep.subr.bf16.mxu1 %v4678_v39 }
  0x30   : > { %4136 = vmatpush3.bf16.msra.mxu0 %v453_v17  ;;  %v3694_v17 = vunpack.c.l.bf16 %v3836_v12 }
  0x31   : > { %4137 = vmatprep.subr.bf16.mxu0 %v454_v20 }
  0x32   : > { %4176 = vmatpush3.bf16.msra.mxu1 %v4678_v39 }
  0x34   : > { %4138 = vmatpush3.bf16.msra.mxu0 %v454_v20  ;;  %v3690_v20 = vunpack.c.l.bf16 %v3835_v14 }
  0x35   : > { %4139 = vmatprep.subr.bf16.mxu0 %v455_v26 }
  0x38   : > { %4140 = vmatpush3.bf16.msra.mxu0 %v455_v26 }
  0x39   : > { %4141 = vmatprep.subr.bf16.mxu0 %v456_v29 }
  0x3c   : > { %4142 = vmatpush3.bf16.msra.mxu0 %v456_v29  ;;  %v3838_v29 = vld [vmem:[%s4985_s30 + $0x38] sm:$0xff]  }
  0x3d   : > { %4143 = vmatprep.subr.bf16.mxu0 %v457_v30 }
  0x40   : > { %4144 = vmatpush3.bf16.msra.mxu0 %v457_v30 }
  0x41   : > { %4193 = vmatprep.subr.bf16.mxu0 %v4679_v40 }
  0x43   : > { %4146 = vmatmul.mubr.bf16.vlgmr.msra.gmra.mrb[0].mxu0 %v4930_v31 }
  0x44   : > { %4149 = vmatprep.mubr.bf16.mxu0 %v4933_v32  ;;  %4194 = vmatpush3.bf16.msra.mxu0 %v4679_v40  ;;  %v3702_v40 = vunpack.c.l.bf16 %v3838_v29 }
  0x45   : > { %4195 = vmatprep.subr.bf16.mxu0 %v4680_v41 }
  0x48   : > { %4196 = vmatpush3.bf16.msra.mxu0 %v4680_v41  ;;  %v3703_v41 = vunpack.c.h.bf16 %v3838_v29 }
  0x49   : > { %4197 = vmatprep.subr.bf16.mxu0 %v4681_v42 }
  0x4b   : > { %4150 = vmatmul.mubr.bf16.gmra.mrb[4].mxu0 %v4938_v33 }
  0x4c   : > { %4153 = vmatprep.mubr.bf16.mxu0 %v4941_v34  ;;  %4198 = vmatpush3.bf16.msra.mxu0 %v4681_v42 }
  0x4d   : > { %4199 = vmatprep.subr.bf16.mxu0 %v4682_v43 }
  0x50   : > { %4200 = vmatpush3.bf16.msra.mxu0 %v4682_v43  ;;  %v3698_v43 = vunpack.c.l.bf16 %v3837_v38 }
  0x51   : > { %4201 = vmatprep.subr.bf16.mxu0 %v4683_v44 }
  0x53   : > { %4154 = vmatmul.mubr.bf16.gmra.mrb[8].mxu0 %v4946_v35 }
  0x54   : > { %4157 = vmatprep.mubr.bf16.mxu0 %v4949_v36  ;;  %4202 = vmatpush3.bf16.msra.mxu0 %v4683_v44  ;;  %v3699_v44 = vunpack.c.h.bf16 %v3837_v38 }
  0x55   : > { %4203 = vmatprep.subr.bf16.mxu0 %v4684_v45 }
  0x58   : > { %4204 = vmatpush3.bf16.msra.mxu0 %v4684_v45 }
  0x5b   : > { %4158 = vmatmul.mubr.bf16.gmra.mrb[12].mxu0 %v4954_v37 }
 0x116   : > { %v4147_v50 = vpop.f32.mrb[0].mxu0 }
 0x117   : > { %v572_v53 = vpop.f32.mrb[1].mxu0  ;;  %v581_v55 = vadd.f32 %v4147_v50, %v3678_v48 }
 0x118   : > { %v4148_v54 = vpop.f32.mrb[2].mxu0  ;;  %v573_v58 = vadd.f32 %v3674_v51, %v572_v53 }
 0x119   : > { %v584_v56 = vadd.f32 %v4148_v54, %v3679_v49  ;;  %v575_v57 = vpop.f32.mrb[3].mxu0  ;;  %v4685_v54 = vld [vmem:[%s5375_s7 + $0x30] sm:$0xff]  }
 0x11a   : > { %v576_v59 = vadd.f32 %v3675_v52, %v575_v57  ;;  %4205 = vmatprep.subr.bf16.mxu0 %v4685_v54 }
 0x11b   : > { %v636_v61 = vpack.c.bf16 %v584_v56, %v581_v55  ;;  %4206 = vmatpush3.bf16.msra.mxu0 %v4685_v54  ;;  %v4686_v55 = vld [vmem:[%s5375_s7 + $0x38] sm:$0xff]   ;;  %v3370_v56 = vld [vmem:[%s5374_s6] ss:$0 sm:$0xff] }
 0x11c   : > { %v635_v63 = vpack.c.bf16 %v576_v59, %v573_v58  ;;  %4207 = vmatprep.subr.bf16.mxu0 %v4686_v55 }
 0x11e   : > { %v4151_v2 = vpop.f32.mrb[4].mxu0  ;;  %4177 = vmatprep.mubr.bf16.mxu1 %v635_v63 }
 0x11f   : > { %v588_v5 = vpop.f32.mrb[5].mxu0  ;;  %4178 = vmatmul.mubr.bf16.vlgmr.msra.gmra.mrb[0].mxu1 %v636_v61  ;;  %v597_v7 = vadd.f32 %v4151_v2, %v3686_v0  ;;  %4208 = vmatpush3.bf16.msra.mxu0 %v4686_v55 }
 0x120   : > { %v4152_v6 = vpop.f32.mrb[6].mxu0  ;;  %v589_v10 = vadd.f32 %v3682_v3, %v588_v5 }
 0x121   : > { %v600_v8 = vadd.f32 %v4152_v6, %v3687_v1  ;;  %v591_v9 = vpop.f32.mrb[7].mxu0 }
 0x122   : > { %v592_v11 = vadd.f32 %v3683_v4, %v591_v9 }
 0x123   : > { %v638_v13 = vpack.c.bf16 %v600_v8, %v597_v7 }
 0x124   : > { %v637_v15 = vpack.c.bf16 %v592_v11, %v589_v10 }
 0x126   : > { %v4155_v19 = vpop.f32.mrb[8].mxu0  ;;  %4181 = vmatprep.mubr.bf16.mxu1 %v637_v15 }
 0x127   : > { %v604_v22 = vpop.f32.mrb[9].mxu0  ;;  %4182 = vmatmul.mubr.bf16.gmra.mrb[4].mxu1 %v638_v13  ;;  %v613_v24 = vadd.f32 %v4155_v19, %v3694_v17 }
 0x128   : > { %v4156_v23 = vpop.f32.mrb[10].mxu0  ;;  %v605_v27 = vadd.f32 %v3690_v20, %v604_v22 }
 0x129   : > { %v616_v25 = vadd.f32 %v4156_v23, %v3695_v18  ;;  %v607_v26 = vpop.f32.mrb[11].mxu0 }
 0x12a   : > { %v608_v28 = vadd.f32 %v3691_v21, %v607_v26 }
 0x12b   : > { %v640_v30 = vpack.c.bf16 %v616_v25, %v613_v24 }
 0x12c   : > { %v639_v39 = vpack.c.bf16 %v608_v28, %v605_v27 }
 0x12e   : > { %v4159_v42 = vpop.f32.mrb[12].mxu0  ;;  %4185 = vmatprep.mubr.bf16.mxu1 %v639_v39 }
 0x12f   : > { %v620_v45 = vpop.f32.mrb[13].mxu0  ;;  %4186 = vmatmul.mubr.bf16.gmra.mrb[8].mxu1 %v640_v30  ;;  %v629_v47 = vadd.f32 %v4159_v42, %v3702_v40 }
 0x130   : > { %v4160_v46 = vpop.f32.mrb[14].mxu0  ;;  %v621_v50 = vadd.f32 %v3698_v43, %v620_v45 }
 0x131   : > { %v632_v48 = vadd.f32 %v4160_v46, %v3703_v41  ;;  %v623_v49 = vpop.f32.mrb[15].mxu0 }
 0x132   : > { %v624_v51 = vadd.f32 %v3699_v44, %v623_v49 }
 0x133   : > { %v642_v52 = vpack.c.bf16 %v632_v48, %v629_v47 }
 0x134   : > { %v641_v53 = vpack.c.bf16 %v624_v51, %v621_v50 }
 0x136   : > { %4189 = vmatprep.mubr.bf16.mxu1 %v641_v53 }
 0x137   : > { %4190 = vmatmul.mubr.bf16.gmra.mrb[12].mxu1 %v642_v52 }
 0x138   : > { %4241 = vmatprep.mubr.bf16.mxu1 %v4915_v16 }
 0x1f2   : > { %v4179_v57 = vpop.f32.mrb[0].mxu1 }
 0x1f3   : > { %v757_v58 = vadd.f32 %v4179_v57, %v3370_v56  ;;  %v748_v59 = vpop.f32.mrb[1].mxu1  ;;  %v4687_v57 = vld [vmem:[%s5373_s5 + $0x40] sm:$0xff]  }
 0x1f4   : > { %v749_v16 = vadd.f32 %v3370_v56, %v748_v59  ;;  %v4180_v60 = vpop.f32.mrb[2].mxu1  ;;  %4257 = vmatprep.subr.bf16.mxu0 %v4687_v57  ;;  %v4690_v59 = vld [vmem:[%s5373_s5 + $0x58] sm:$0xff]  }
 0x1f5   : > { %v760_v61 = vadd.f32 %v4180_v60, %v3370_v56  ;;  %v751_v62 = vpop.f32.mrb[3].mxu1  ;;  %v813_v0 = vmax.f32 %v757_v58, 0.0  ;;  %v4688_v58 = vld [vmem:[%s5373_s5 + $0x48] sm:$0xff]  }
 0x1f6   : > { %v752_v63 = vadd.f32 %v3370_v56, %v751_v62  ;;  %v811_v2 = vmax.f32 %v749_v16, 0.0  ;;  %v4691_v16 = vld [vmem:[%s5373_s5 + $0x60] sm:$0xff]   ;;  %v4692_v60 = vld [vmem:[%s5373_s5 + $0x68] sm:$0xff]  }
 0x1f7   : > { %v814_v1 = vmax.f32 %v760_v61, 0.0  ;;  %v3379_v61 = vld [vmem:[%s5376_s8] ss:$0 sm:$0xff] }
 0x1f8   : > { %v812_v3 = vmax.f32 %v752_v63, 0.0 }
 0x1f9   : > { %v828_v4 = vpack.c.bf16 %v814_v1, %v813_v0 }
 0x1fa   : > { %v827_v5 = vpack.c.bf16 %v812_v3, %v811_v2  ;;  %v4183_v6 = vpop.f32.mrb[4].mxu1 }
 0x1fb   : > { %v773_v7 = vadd.f32 %v4183_v6, %v3370_v56  ;;  %v764_v8 = vpop.f32.mrb[5].mxu1 }
 0x1fc   : > { %v765_v9 = vadd.f32 %v3370_v56, %v764_v8  ;;  %v4184_v10 = vpop.f32.mrb[6].mxu1  ;;  %4209 = vmatprep.mubr.bf16.mxu0 %v827_v5 }
 0x1fd   : > { %v776_v11 = vadd.f32 %v4184_v10, %v3370_v56  ;;  %v767_v12 = vpop.f32.mrb[7].mxu1  ;;  %4210 = vmatmul.mubr.bf16.vlgmr.msra.gmra.mrb[16].mxu0 %v828_v4  ;;  %v817_v14 = vmax.f32 %v773_v7, 0.0 }
 0x1fe   : > { %v768_v13 = vadd.f32 %v3370_v56, %v767_v12  ;;  %v815_v17 = vmax.f32 %v765_v9, 0.0  ;;  %4258 = vmatpush3.bf16.msra.mxu0 %v4687_v57 }
 0x1ff   : > { %v818_v15 = vmax.f32 %v776_v11, 0.0  ;;  %4259 = vmatprep.subr.bf16.mxu0 %v4688_v58 }
 0x200   : > { %v816_v18 = vmax.f32 %v768_v13, 0.0 }
 0x201   : > { %v830_v19 = vpack.c.bf16 %v818_v15, %v817_v14 }
 0x202   : > { %v829_v20 = vpack.c.bf16 %v816_v18, %v815_v17  ;;  %v4187_v21 = vpop.f32.mrb[8].mxu1  ;;  %4260 = vmatpush3.bf16.msra.mxu0 %v4688_v58 }
 0x203   : > { %v789_v22 = vadd.f32 %v4187_v21, %v3370_v56  ;;  %v780_v23 = vpop.f32.mrb[9].mxu1 }
 0x204   : > { %v781_v24 = vadd.f32 %v3370_v56, %v780_v23  ;;  %v4188_v25 = vpop.f32.mrb[10].mxu1  ;;  %4213 = vmatprep.mubr.bf16.mxu0 %v829_v20 }
 0x205   : > { %v792_v26 = vadd.f32 %v4188_v25, %v3370_v56  ;;  %v783_v27 = vpop.f32.mrb[11].mxu1  ;;  %4214 = vmatmul.mubr.bf16.gmra.mrb[20].mxu0 %v830_v19  ;;  %v821_v29 = vmax.f32 %v789_v22, 0.0 }
 0x206   : > { %v784_v28 = vadd.f32 %v3370_v56, %v783_v27  ;;  %v819_v38 = vmax.f32 %v781_v24, 0.0 }
 0x207   : > { %v822_v30 = vmax.f32 %v792_v26, 0.0 }
 0x208   : > { %v820_v39 = vmax.f32 %v784_v28, 0.0 }
 0x209   : > { %v832_v40 = vpack.c.bf16 %v822_v30, %v821_v29 }
 0x20a   : > { %v831_v41 = vpack.c.bf16 %v820_v39, %v819_v38  ;;  %v4191_v42 = vpop.f32.mrb[12].mxu1 }
 0x20b   : > { %v805_v43 = vadd.f32 %v4191_v42, %v3370_v56  ;;  %v796_v44 = vpop.f32.mrb[13].mxu1 }
 0x20c   : > { %v797_v45 = vadd.f32 %v3370_v56, %v796_v44  ;;  %v4192_v46 = vpop.f32.mrb[14].mxu1  ;;  %4217 = vmatprep.mubr.bf16.mxu0 %v831_v41 }
 0x20d   : > { %v808_v47 = vadd.f32 %v4192_v46, %v3370_v56  ;;  %v799_v48 = vpop.f32.mrb[15].mxu1  ;;  %4218 = vmatmul.mubr.bf16.gmra.mrb[24].mxu0 %v832_v40  ;;  %v825_v50 = vmax.f32 %v805_v43, 0.0 }
 0x20e   : > { %v800_v49 = vadd.f32 %v3370_v56, %v799_v48  ;;  %v823_v52 = vmax.f32 %v797_v45, 0.0  ;;  %v4689_v56 = vld [vmem:[%s5373_s5 + $0x50] sm:$0xff]  }
 0x20f   : > { %v826_v51 = vmax.f32 %v808_v47, 0.0  ;;  %4261 = vmatprep.subr.bf16.mxu0 %v4689_v56 }
 0x210   : > { %v824_v53 = vmax.f32 %v800_v49, 0.0  ;;  %4262 = vmatpush3.bf16.msra.mxu0 %v4689_v56 }
 0x211   : > { %v834_v54 = vpack.c.bf16 %v826_v51, %v825_v50  ;;  %4263 = vmatprep.subr.bf16.mxu0 %v4690_v59 }
 0x212   : > { %v833_v55 = vpack.c.bf16 %v824_v53, %v823_v52 }
 0x214   : > { %4221 = vmatprep.mubr.bf16.mxu0 %v833_v55  ;;  %4264 = vmatpush3.bf16.msra.mxu0 %v4690_v59 }
 0x215   : > { %4222 = vmatmul.mubr.bf16.gmra.mrb[28].mxu0 %v834_v54  ;;  %4265 = vmatprep.subr.bf16.mxu0 %v4691_v16 }
 0x218   : > { %4266 = vmatpush3.bf16.msra.mxu0 %v4691_v16 }
 0x219   : > { %4267 = vmatprep.subr.bf16.mxu0 %v4692_v60 }
 0x21c   : > { %4268 = vmatpush3.bf16.msra.mxu0 %v4692_v60 }
 0x2d0   : > { %v4211_v62 = vpop.f32.mrb[16].mxu0 }
 0x2d1   : > { %v949_v63 = vadd.f32 %v4211_v62, %v3379_v61  ;;  %v940_v0 = vpop.f32.mrb[17].mxu0  ;;  %v3840_v62 = vld [vmem:[%s4985_s30 + $0x48] sm:$0xff]  }
 0x2d2   : > { %v941_v1 = vadd.f32 %v3379_v61, %v940_v0  ;;  %v4212_v2 = vpop.f32.mrb[18].mxu0  ;;  %v3710_v0 = vunpack.c.l.bf16 %v3840_v62 }
 0x2d3   : > { %v952_v3 = vadd.f32 %v4212_v2, %v3379_v61  ;;  %v943_v4 = vpop.f32.mrb[19].mxu0  ;;  %v1005_v6 = vmax.f32 %v949_v63, 0.0  ;;  %v3839_v63 = vld [vmem:[%s4985_s30 + $0x40] sm:$0xff]  }
 0x2d4   : > { %v944_v5 = vadd.f32 %v3379_v61, %v943_v4  ;;  %v1003_v8 = vmax.f32 %v941_v1, 0.0  ;;  %v3711_v1 = vunpack.c.h.bf16 %v3840_v62  ;;  %v3707_v4 = vunpack.c.h.bf16 %v3839_v63  ;;  %v5066_v62 = vld [vmem:[%s4907_s20] sm:$0xff]  }
 0x2d5   : > { %v1006_v7 = vmax.f32 %v952_v3, 0.0  ;;  %v3706_v3 = vunpack.c.l.bf16 %v3839_v63  ;;  %v4701_v63 = vld [vmem:[%s5375_s7 + $0x70] sm:$0xff]  }
 0x2d6   : > { %v1004_v9 = vmax.f32 %v944_v5, 0.0 }
 0x2d7   : > { %v1020_v10 = vpack.c.bf16 %v1006_v7, %v1005_v6 }
 0x2d8   : > { %v1019_v11 = vpack.c.bf16 %v1004_v9, %v1003_v8  ;;  %v4215_v12 = vpop.f32.mrb[20].mxu0 }
 0x2d9   : > { %v965_v13 = vadd.f32 %v4215_v12, %v3379_v61  ;;  %v956_v14 = vpop.f32.mrb[21].mxu0  ;;  %v3842_v12 = vld [vmem:[%s4985_s30 + $0x58] sm:$0xff]  }
 0x2da   : > { %v957_v15 = vadd.f32 %v3379_v61, %v956_v14  ;;  %v4216_v17 = vpop.f32.mrb[22].mxu0  ;;  %4225 = vmatprep.subr.bf16.mxu1 %v1019_v11  ;;  %v3841_v14 = vld [vmem:[%s4985_s30 + $0x50] sm:$0xff]  }
 0x2db   : > { %v968_v18 = vadd.f32 %v4216_v17, %v3379_v61  ;;  %v959_v19 = vpop.f32.mrb[23].mxu0  ;;  %4226 = vmatpush3.bf16.msra.mxu1 %v1019_v11  ;;  %v1009_v21 = vmax.f32 %v965_v13, 0.0  ;;  %v3718_v17 = vunpack.c.l.bf16 %v3842_v12 }
 0x2dc   : > { %v960_v20 = vadd.f32 %v3379_v61, %v959_v19  ;;  %4227 = vmatprep.subr.bf16.mxu1 %v1020_v10  ;;  %v1007_v23 = vmax.f32 %v957_v15, 0.0 }
 0x2dd   : > { %v1010_v22 = vmax.f32 %v968_v18, 0.0  ;;  %v3719_v18 = vunpack.c.h.bf16 %v3842_v12 }
 0x2de   : > { %v1008_v24 = vmax.f32 %v960_v20, 0.0  ;;  %v3714_v20 = vunpack.c.l.bf16 %v3841_v14 }
 0x2df   : > { %v1022_v25 = vpack.c.bf16 %v1010_v22, %v1009_v21  ;;  %4228 = vmatpush3.bf16.msra.mxu1 %v1020_v10  ;;  %v3715_v21 = vunpack.c.h.bf16 %v3841_v14 }
 0x2e0   : > { %v1021_v26 = vpack.c.bf16 %v1008_v24, %v1007_v23  ;;  %v4219_v27 = vpop.f32.mrb[24].mxu0 }
 0x2e1   : > { %v981_v28 = vadd.f32 %v4219_v27, %v3379_v61  ;;  %v972_v29 = vpop.f32.mrb[25].mxu0 }
 0x2e2   : > { %v973_v30 = vadd.f32 %v3379_v61, %v972_v29  ;;  %v4220_v38 = vpop.f32.mrb[26].mxu0  ;;  %4229 = vmatprep.subr.bf16.mxu1 %v1021_v26  ;;  %v3844_v29 = vld [vmem:[%s4985_s30 + $0x68] sm:$0xff]  }
 0x2e3   : > { %v984_v39 = vadd.f32 %v4220_v38, %v3379_v61  ;;  %v975_v40 = vpop.f32.mrb[27].mxu0  ;;  %4230 = vmatpush3.bf16.msra.mxu1 %v1021_v26  ;;  %v1013_v42 = vmax.f32 %v981_v28, 0.0  ;;  %v3843_v38 = vld [vmem:[%s4985_s30 + $0x60] sm:$0xff]  }
 0x2e4   : > { %v976_v41 = vadd.f32 %v3379_v61, %v975_v40  ;;  %4231 = vmatprep.subr.bf16.mxu1 %v1022_v25  ;;  %v1011_v44 = vmax.f32 %v973_v30, 0.0  ;;  %v3726_v40 = vunpack.c.l.bf16 %v3844_v29 }
 0x2e5   : > { %v1014_v43 = vmax.f32 %v984_v39, 0.0 }
 0x2e6   : > { %v1012_v45 = vmax.f32 %v976_v41, 0.0  ;;  %v3727_v41 = vunpack.c.h.bf16 %v3844_v29 }
 0x2e7   : > { %v1024_v46 = vpack.c.bf16 %v1014_v43, %v1013_v42  ;;  %4232 = vmatpush3.bf16.msra.mxu1 %v1022_v25  ;;  %v3722_v43 = vunpack.c.l.bf16 %v3843_v38 }
 0x2e8   : > { %v1023_v47 = vpack.c.bf16 %v1012_v45, %v1011_v44  ;;  %v4223_v48 = vpop.f32.mrb[28].mxu0  ;;  %v3723_v44 = vunpack.c.h.bf16 %v3843_v38 }
 0x2e9   : > { %v997_v49 = vadd.f32 %v4223_v48, %v3379_v61  ;;  %v988_v50 = vpop.f32.mrb[29].mxu0 }
 0x2ea   : > { %v989_v51 = vadd.f32 %v3379_v61, %v988_v50  ;;  %v4224_v52 = vpop.f32.mrb[30].mxu0  ;;  %4233 = vmatprep.subr.bf16.mxu1 %v1023_v47 }
 0x2eb   : > { %v1000_v53 = vadd.f32 %v4224_v52, %v3379_v61  ;;  %v991_v54 = vpop.f32.mrb[31].mxu0  ;;  %4234 = vmatpush3.bf16.msra.mxu1 %v1023_v47  ;;  %v1017_v57 = vmax.f32 %v997_v49, 0.0  ;;  %v3846_v52 = vld [vmem:[%s4985_s30 + $0x78] sm:$0xff]  }
 0x2ec   : > { %v992_v55 = vadd.f32 %v3379_v61, %v991_v54  ;;  %4235 = vmatprep.subr.bf16.mxu1 %v1024_v46  ;;  %v1015_v56 = vmax.f32 %v989_v51, 0.0  ;;  %v4693_v61 = vld [vmem:[%s5373_s5 + $0x70] sm:$0xff]  }
 0x2ed   : > { %v1018_v58 = vmax.f32 %v1000_v53, 0.0  ;;  %4269 = vmatprep.subr.bf16.mxu0 %v4693_v61  ;;  %v3845_v54 = vld [vmem:[%s4985_s30 + $0x70] sm:$0xff]  }
 0x2ee   : > { %v1016_v59 = vmax.f32 %v992_v55, 0.0  ;;  %4270 = vmatpush3.bf16.msra.mxu0 %v4693_v61 }
 0x2ef   : > { %v1026_v16 = vpack.c.bf16 %v1018_v58, %v1017_v57  ;;  %4236 = vmatpush3.bf16.msra.mxu1 %v1024_v46  ;;  %v3734_v57 = vunpack.c.l.bf16 %v3846_v52  ;;  %v3735_v58 = vunpack.c.h.bf16 %v3846_v52 }
 0x2f0   : > { %v1025_v60 = vpack.c.bf16 %v1016_v59, %v1015_v56  ;;  %v3730_v59 = vunpack.c.l.bf16 %v3845_v54 }
 0x2f2   : > { %4237 = vmatprep.subr.bf16.mxu1 %v1025_v60 }
 0x2f3   : > { %4238 = vmatpush3.bf16.msra.mxu1 %v1025_v60 }
 0x2f4   : > { %4239 = vmatprep.subr.bf16.mxu1 %v1026_v16 }
 0x2f7   : > { %4240 = vmatpush3.bf16.msra.mxu1 %v1026_v16  ;;  %v3731_v16 = vunpack.c.h.bf16 %v3845_v54 }
 0x2fa   : > { %4242 = vmatmul.mubr.bf16.vlgmr.msra.gmra.mrb[16].mxu1 %v4930_v31  ;;  %v4694_v31 = vld [vmem:[%s5373_s5 + $0x78] sm:$0xff]  }
 0x2fb   : > { %4245 = vmatprep.mubr.bf16.mxu1 %v4933_v32  ;;  %4271 = vmatprep.subr.bf16.mxu0 %v4694_v31  ;;  %v4695_v32 = vld [vmem:[%s5375_s7 + $0x40] sm:$0xff]  }
 0x2fc   : > { %4272 = vmatpush3.bf16.msra.mxu0 %v4694_v31  ;;  %4289 = vmatprep.subr.bf16.mxu1 %v4695_v32 }
 0x2fd   : > { %4290 = vmatpush3.bf16.msra.mxu1 %v4695_v32 }
 0x302   : > { %4246 = vmatmul.mubr.bf16.gmra.mrb[20].mxu1 %v4938_v33  ;;  %v4696_v33 = vld [vmem:[%s5375_s7 + $0x48] sm:$0xff]  }
 0x303   : > { %4249 = vmatprep.mubr.bf16.mxu1 %v4941_v34  ;;  %4291 = vmatprep.subr.bf16.mxu1 %v4696_v33  ;;  %v4697_v34 = vld [vmem:[%s5375_s7 + $0x50] sm:$0xff]  }
 0x304   : > { %4292 = vmatpush3.bf16.msra.mxu1 %v4696_v33 }
 0x305   : > { %4293 = vmatprep.subr.bf16.mxu1 %v4697_v34 }
 0x308   : > { %4294 = vmatpush3.bf16.msra.mxu1 %v4697_v34 }
 0x30a   : > { %4250 = vmatmul.mubr.bf16.gmra.mrb[24].mxu1 %v4946_v35  ;;  %v4698_v35 = vld [vmem:[%s5375_s7 + $0x58] sm:$0xff]  }
 0x30b   : > { %4253 = vmatprep.mubr.bf16.mxu1 %v4949_v36  ;;  %4295 = vmatprep.subr.bf16.mxu1 %v4698_v35  ;;  %v4699_v36 = vld [vmem:[%s5375_s7 + $0x60] sm:$0xff]  }
 0x30c   : > { %4296 = vmatpush3.bf16.msra.mxu1 %v4698_v35 }
 0x30d   : > { %4297 = vmatprep.subr.bf16.mxu1 %v4699_v36 }
 0x310   : > { %4298 = vmatpush3.bf16.msra.mxu1 %v4699_v36 }
 0x312   : > { %4254 = vmatmul.mubr.bf16.gmra.mrb[28].mxu1 %v4954_v37  ;;  %v4700_v37 = vld [vmem:[%s5375_s7 + $0x68] sm:$0xff]  }
 0x313   : > { %4299 = vmatprep.subr.bf16.mxu1 %v4700_v37 }
 0x314   : > { %4300 = vmatpush3.bf16.msra.mxu1 %v4700_v37 }
 0x315   : > { %4301 = vmatprep.subr.bf16.mxu1 %v4701_v63 }
 0x318   : > { %4302 = vmatpush3.bf16.msra.mxu1 %v4701_v63  ;;  %v4707_v63 = vld [vmem:[%s5373_s5 + $0xa0] sm:$0xff]  }
 0x3cd   : > { %v4243_v2 = vpop.f32.mrb[16].mxu1 }
 0x3ce   : > { %v1094_v5 = vpop.f32.mrb[17].mxu1  ;;  %v1103_v7 = vadd.f32 %v4243_v2, %v3710_v0  ;;  %v4702_v0 = vld [vmem:[%s5375_s7 + $0x78] sm:$0xff]  }
 0x3cf   : > { %v4244_v6 = vpop.f32.mrb[18].mxu1  ;;  %v1095_v10 = vadd.f32 %v3706_v3, %v1094_v5  ;;  %4303 = vmatprep.subr.bf16.mxu1 %v4702_v0 }
 0x3d0   : > { %v1106_v8 = vadd.f32 %v4244_v6, %v3711_v1  ;;  %v1097_v9 = vpop.f32.mrb[19].mxu1  ;;  %4304 = vmatpush3.bf16.msra.mxu1 %v4702_v0  ;;  %v3421_v1 = vld [vmem:[%s5374_s6 + $0x1] ss:$0 sm:$0xff]  ;;  %v4708_v0 = vld [vmem:[%s5373_s5 + $0xa8] sm:$0xff]  }
 0x3d1   : > { %v1098_v11 = vadd.f32 %v3707_v4, %v1097_v9 }
 0x3d2   : > { %v1158_v13 = vpack.c.bf16 %v1106_v8, %v1103_v7 }
 0x3d3   : > { %v1157_v15 = vpack.c.bf16 %v1098_v11, %v1095_v10 }
 0x3d5   : > { %v4247_v19 = vpop.f32.mrb[20].mxu1  ;;  %4273 = vmatprep.mubr.bf16.mxu0 %v1157_v15 }
 0x3d6   : > { %v1110_v22 = vpop.f32.mrb[21].mxu1  ;;  %4274 = vmatmul.mubr.bf16.vlgmr.msra.gmra.mrb[32].mxu0 %v1158_v13  ;;  %v1119_v24 = vadd.f32 %v4247_v19, %v3718_v17 }
 0x3d7   : > { %v4248_v23 = vpop.f32.mrb[22].mxu1  ;;  %v1111_v27 = vadd.f32 %v3714_v20, %v1110_v22 }
 0x3d8   : > { %v1122_v25 = vadd.f32 %v4248_v23, %v3719_v18  ;;  %v1113_v26 = vpop.f32.mrb[23].mxu1 }
 0x3d9   : > { %v1114_v28 = vadd.f32 %v3715_v21, %v1113_v26 }
 0x3da   : > { %v1160_v30 = vpack.c.bf16 %v1122_v25, %v1119_v24 }
 0x3db   : > { %v1159_v39 = vpack.c.bf16 %v1114_v28, %v1111_v27 }
 0x3dd   : > { %v4251_v42 = vpop.f32.mrb[24].mxu1  ;;  %4277 = vmatprep.mubr.bf16.mxu0 %v1159_v39 }
 0x3de   : > { %v1126_v45 = vpop.f32.mrb[25].mxu1  ;;  %4278 = vmatmul.mubr.bf16.gmra.mrb[36].mxu0 %v1160_v30  ;;  %v1135_v47 = vadd.f32 %v4251_v42, %v3726_v40 }
 0x3df   : > { %v4252_v46 = vpop.f32.mrb[26].mxu1  ;;  %v1127_v50 = vadd.f32 %v3722_v43, %v1126_v45 }
 0x3e0   : > { %v1138_v48 = vadd.f32 %v4252_v46, %v3727_v41  ;;  %v1129_v49 = vpop.f32.mrb[27].mxu1 }
 0x3e1   : > { %v1130_v51 = vadd.f32 %v3723_v44, %v1129_v49 }
 0x3e2   : > { %v1162_v53 = vpack.c.bf16 %v1138_v48, %v1135_v47 }
 0x3e3   : > { %v1161_v55 = vpack.c.bf16 %v1130_v51, %v1127_v50 }
 0x3e5   : > { %v4255_v56 = vpop.f32.mrb[28].mxu1  ;;  %4281 = vmatprep.mubr.bf16.mxu0 %v1161_v55 }
 0x3e6   : > { %v1142_v60 = vpop.f32.mrb[29].mxu1  ;;  %4282 = vmatmul.mubr.bf16.gmra.mrb[40].mxu0 %v1162_v53  ;;  %v1151_v31 = vadd.f32 %v4255_v56, %v3734_v57 }
 0x3e7   : > { %v4256_v61 = vpop.f32.mrb[30].mxu1  ;;  %v1143_v34 = vadd.f32 %v3730_v59, %v1142_v60 }
 0x3e8   : > { %v1154_v32 = vadd.f32 %v4256_v61, %v3735_v58  ;;  %v1145_v33 = vpop.f32.mrb[31].mxu1 }
 0x3e9   : > { %v1146_v35 = vadd.f32 %v3731_v16, %v1145_v33 }
 0x3ea   : > { %v1164_v36 = vpack.c.bf16 %v1154_v32, %v1151_v31 }
 0x3eb   : > { %v1163_v37 = vpack.c.bf16 %v1146_v35, %v1143_v34  ;;  %v4703_v34 = vld [vmem:[%s5373_s5 + $0x80] sm:$0xff]   ;;  %v4704_v35 = vld [vmem:[%s5373_s5 + $0x88] sm:$0xff]  }
 0x3ec   : > { %4353 = vmatprep.subr.bf16.mxu1 %v4703_v34 }
 0x3ed   : > { %4285 = vmatprep.mubr.bf16.mxu0 %v1163_v37  ;;  %v4706_v37 = vld [vmem:[%s5373_s5 + $0x98] sm:$0xff]  }
 0x3ee   : > { %4286 = vmatmul.mubr.bf16.gmra.mrb[44].mxu0 %v1164_v36  ;;  %v4705_v36 = vld [vmem:[%s5373_s5 + $0x90] sm:$0xff]  }
 0x3ef   : > { %4337 = vmatprep.mubr.bf16.mxu0 %v5066_v62 }
 0x4a9   : > { %v4275_v2 = vpop.f32.mrb[32].mxu0 }
 0x4aa   : > { %v1281_v3 = vadd.f32 %v4275_v2, %v3421_v1  ;;  %v1272_v4 = vpop.f32.mrb[33].mxu0 }
 0x4ab   : > { %v1273_v5 = vadd.f32 %v3421_v1, %v1272_v4  ;;  %v4276_v6 = vpop.f32.mrb[34].mxu0 }
 0x4ac   : > { %v1284_v7 = vadd.f32 %v4276_v6, %v3421_v1  ;;  %v1275_v8 = vpop.f32.mrb[35].mxu0  ;;  %v1337_v10 = vmax.f32 %v1281_v3, 0.0 }
 0x4ad   : > { %v1276_v9 = vadd.f32 %v3421_v1, %v1275_v8  ;;  %v1335_v12 = vmax.f32 %v1273_v5, 0.0 }
 0x4ae   : > { %v1338_v11 = vmax.f32 %v1284_v7, 0.0 }
 0x4af   : > { %v1336_v13 = vmax.f32 %v1276_v9, 0.0 }
 0x4b0   : > { %v1352_v14 = vpack.c.bf16 %v1338_v11, %v1337_v10 }
 0x4b1   : > { %v1351_v15 = vpack.c.bf16 %v1336_v13, %v1335_v12  ;;  %v4279_v17 = vpop.f32.mrb[36].mxu0 }
 0x4b2   : > { %v1297_v18 = vadd.f32 %v4279_v17, %v3421_v1  ;;  %v1288_v19 = vpop.f32.mrb[37].mxu0 }
 0x4b3   : > { %v1289_v20 = vadd.f32 %v3421_v1, %v1288_v19  ;;  %v4280_v21 = vpop.f32.mrb[38].mxu0  ;;  %4305 = vmatprep.mubr.bf16.mxu1 %v1351_v15 }
 0x4b4   : > { %v1300_v22 = vadd.f32 %v4280_v21, %v3421_v1  ;;  %v1291_v23 = vpop.f32.mrb[39].mxu0  ;;  %4306 = vmatmul.mubr.bf16.vlgmr.msra.gmra.mrb[32].mxu1 %v1352_v14  ;;  %v1341_v25 = vmax.f32 %v1297_v18, 0.0 }
 0x4b5   : > { %v1292_v24 = vadd.f32 %v3421_v1, %v1291_v23  ;;  %v1339_v27 = vmax.f32 %v1289_v20, 0.0  ;;  %4354 = vmatpush3.bf16.msra.mxu1 %v4703_v34  ;;  %v5100_v34 = vld [vmem:[%s4907_s20 + $0x8] sm:$0xff]  }
 0x4b6   : > { %v1342_v26 = vmax.f32 %v1300_v22, 0.0  ;;  %4355 = vmatprep.subr.bf16.mxu1 %v4704_v35 }
 0x4b7   : > { %v1340_v28 = vmax.f32 %v1292_v24, 0.0 }
 0x4b8   : > { %v1354_v29 = vpack.c.bf16 %v1342_v26, %v1341_v25 }
 0x4b9   : > { %v1353_v30 = vpack.c.bf16 %v1340_v28, %v1339_v27  ;;  %v4283_v38 = vpop.f32.mrb[40].mxu0  ;;  %4356 = vmatpush3.bf16.msra.mxu1 %v4704_v35  ;;  %v5104_v35 = vld [vmem:[%s4907_s20 + $0x10] sm:$0xff]  }
 0x4ba   : > { %v1313_v39 = vadd.f32 %v4283_v38, %v3421_v1  ;;  %v1304_v40 = vpop.f32.mrb[41].mxu0  ;;  %4357 = vmatprep.subr.bf16.mxu1 %v4705_v36 }
 0x4bb   : > { %v1305_v41 = vadd.f32 %v3421_v1, %v1304_v40  ;;  %v4284_v42 = vpop.f32.mrb[42].mxu0  ;;  %4309 = vmatprep.mubr.bf16.mxu1 %v1353_v30 }
 0x4bc   : > { %v1316_v43 = vadd.f32 %v4284_v42, %v3421_v1  ;;  %v1307_v44 = vpop.f32.mrb[43].mxu0  ;;  %4310 = vmatmul.mubr.bf16.gmra.mrb[36].mxu1 %v1354_v29  ;;  %v1345_v46 = vmax.f32 %v1313_v39, 0.0 }
 0x4bd   : > { %v1308_v45 = vadd.f32 %v3421_v1, %v1307_v44  ;;  %v1343_v48 = vmax.f32 %v1305_v41, 0.0  ;;  %4358 = vmatpush3.bf16.msra.mxu1 %v4705_v36  ;;  %v5108_v36 = vld [vmem:[%s4907_s20 + $0x18] sm:$0xff]  }
 0x4be   : > { %v1346_v47 = vmax.f32 %v1316_v43, 0.0  ;;  %4359 = vmatprep.subr.bf16.mxu1 %v4706_v37 }
 0x4bf   : > { %v1344_v49 = vmax.f32 %v1308_v45, 0.0 }
 0x4c0   : > { %v1356_v50 = vpack.c.bf16 %v1346_v47, %v1345_v46 }
 0x4c1   : > { %v1355_v51 = vpack.c.bf16 %v1344_v49, %v1343_v48  ;;  %v4287_v52 = vpop.f32.mrb[44].mxu0  ;;  %4360 = vmatpush3.bf16.msra.mxu1 %v4706_v37  ;;  %v5112_v37 = vld [vmem:[%s4907_s20 + $0x20] sm:$0xff]  }
 0x4c2   : > { %v1329_v53 = vadd.f32 %v4287_v52, %v3421_v1  ;;  %v1320_v54 = vpop.f32.mrb[45].mxu0  ;;  %4361 = vmatprep.subr.bf16.mxu1 %v4707_v63 }
 0x4c3   : > { %v1321_v55 = vadd.f32 %v3421_v1, %v1320_v54  ;;  %v4288_v57 = vpop.f32.mrb[46].mxu0  ;;  %4313 = vmatprep.mubr.bf16.mxu1 %v1355_v51 }
 0x4c4   : > { %v1332_v58 = vadd.f32 %v4288_v57, %v3421_v1  ;;  %v1323_v56 = vpop.f32.mrb[47].mxu0  ;;  %4314 = vmatmul.mubr.bf16.gmra.mrb[40].mxu1 %v1356_v50  ;;  %v1349_v16 = vmax.f32 %v1329_v53, 0.0 }
 0x4c5   : > { %v1324_v59 = vadd.f32 %v3421_v1, %v1323_v56  ;;  %v1347_v61 = vmax.f32 %v1321_v55, 0.0  ;;  %4362 = vmatpush3.bf16.msra.mxu1 %v4707_v63  ;;  %v3447_v1 = vld [vmem:[%s5376_s8 + $0x1] ss:$0 sm:$0xff]  ;;  %v5116_v63 = vld [vmem:[%s4907_s20 + $0x28] sm:$0xff]  }
 0x4c6   : > { %v1350_v60 = vmax.f32 %v1332_v58, 0.0  ;;  %4363 = vmatprep.subr.bf16.mxu1 %v4708_v0 }
 0x4c7   : > { %v1348_v31 = vmax.f32 %v1324_v59, 0.0 }
 0x4c8   : > { %v1358_v32 = vpack.c.bf16 %v1350_v60, %v1349_v16 }
 0x4c9   : > { %v1357_v33 = vpack.c.bf16 %v1348_v31, %v1347_v61  ;;  %4364 = vmatpush3.bf16.msra.mxu1 %v4708_v0  ;;  %v5120_v0 = vld [vmem:[%s4907_s20 + $0x30] sm:$0xff]  }
 0x4cb   : > { %4317 = vmatprep.mubr.bf16.mxu1 %v1357_v33 }
 0x4cc   : > { %4318 = vmatmul.mubr.bf16.gmra.mrb[44].mxu1 %v1358_v32 }
 0x587   : > { %v4307_v2 = vpop.f32.mrb[32].mxu1 }
 0x588   : > { %v1475_v3 = vadd.f32 %v4307_v2, %v3447_v1  ;;  %v1466_v4 = vpop.f32.mrb[33].mxu1  ;;  %v4709_v2 = vld [vmem:[%s5373_s5 + $0xb0] sm:$0xff]  }
 0x589   : > { %v1467_v5 = vadd.f32 %v3447_v1, %v1466_v4  ;;  %v4308_v6 = vpop.f32.mrb[34].mxu1  ;;  %4365 = vmatprep.subr.bf16.mxu1 %v4709_v2  ;;  %v4711_v4 = vld [vmem:[%s5375_s7 + $0x80] sm:$0xff]  }
 0x58a   : > { %v1478_v7 = vadd.f32 %v4308_v6, %v3447_v1  ;;  %v1469_v8 = vpop.f32.mrb[35].mxu1  ;;  %v1531_v10 = vmax.f32 %v1475_v3, 0.0  ;;  %4366 = vmatpush3.bf16.msra.mxu1 %v4709_v2  ;;  %v4710_v3 = vld [vmem:[%s5373_s5 + $0xb8] sm:$0xff]   ;;  %v4713_v6 = vld [vmem:[%s5375_s7 + $0x90] sm:$0xff]  }
 0x58b   : > { %v1470_v9 = vadd.f32 %v3447_v1, %v1469_v8  ;;  %v1529_v12 = vmax.f32 %v1467_v5, 0.0  ;;  %4367 = vmatprep.subr.bf16.mxu1 %v4710_v3  ;;  %v4712_v5 = vld [vmem:[%s5375_s7 + $0x88] sm:$0xff]   ;;  %v4715_v8 = vld [vmem:[%s5375_s7 + $0xa0] sm:$0xff]   ;;  %v3853_v2 = vld [vmem:[%s4985_s30 + $0xb0] sm:$0xff]  }
 0x58c   : > { %v1532_v11 = vmax.f32 %v1478_v7, 0.0  ;;  %v4714_v7 = vld [vmem:[%s5375_s7 + $0x98] sm:$0xff]  }
 0x58d   : > { %v1530_v13 = vmax.f32 %v1470_v9, 0.0  ;;  %v4716_v9 = vld [vmem:[%s5375_s7 + $0xa8] sm:$0xff]  }
 0x58e   : > { %v1546_v14 = vpack.c.bf16 %v1532_v11, %v1531_v10  ;;  %4368 = vmatpush3.bf16.msra.mxu1 %v4710_v3  ;;  %v3848_v10 = vld [vmem:[%s4985_s30 + $0x88] sm:$0xff]   ;;  %v3847_v11 = vld [vmem:[%s4985_s30 + $0x80] sm:$0xff]  }
 0x58f   : > { %v1545_v15 = vpack.c.bf16 %v1530_v13, %v1529_v12  ;;  %v4311_v17 = vpop.f32.mrb[36].mxu1  ;;  %v3742_v12 = vunpack.c.l.bf16 %v3848_v10  ;;  %v3743_v13 = vunpack.c.h.bf16 %v3848_v10 }
 0x590   : > { %v1491_v18 = vadd.f32 %v4311_v17, %v3447_v1  ;;  %v1482_v19 = vpop.f32.mrb[37].mxu1  ;;  %v3739_v17 = vunpack.c.h.bf16 %v3847_v11 }
 0x591   : > { %v1483_v20 = vadd.f32 %v3447_v1, %v1482_v19  ;;  %v4312_v21 = vpop.f32.mrb[38].mxu1  ;;  %4321 = vmatprep.subr.bf16.mxu0 %v1545_v15 }
 0x592   : > { %v1494_v22 = vadd.f32 %v4312_v21, %v3447_v1  ;;  %v1485_v23 = vpop.f32.mrb[39].mxu1  ;;  %4322 = vmatpush3.bf16.msra.mxu0 %v1545_v15  ;;  %v1535_v25 = vmax.f32 %v1491_v18, 0.0  ;;  %v3738_v15 = vunpack.c.l.bf16 %v3847_v11 }
 0x593   : > { %v1486_v24 = vadd.f32 %v3447_v1, %v1485_v23  ;;  %4323 = vmatprep.subr.bf16.mxu0 %v1546_v14  ;;  %v1533_v27 = vmax.f32 %v1483_v20, 0.0 }
 0x594   : > { %v1536_v26 = vmax.f32 %v1494_v22, 0.0 }
 0x595   : > { %v1534_v28 = vmax.f32 %v1486_v24, 0.0 }
 0x596   : > { %v1548_v29 = vpack.c.bf16 %v1536_v26, %v1535_v25  ;;  %4324 = vmatpush3.bf16.msra.mxu0 %v1546_v14  ;;  %v3850_v25 = vld [vmem:[%s4985_s30 + $0x98] sm:$0xff]  }
 0x597   : > { %v1547_v30 = vpack.c.bf16 %v1534_v28, %v1533_v27  ;;  %v4315_v38 = vpop.f32.mrb[40].mxu1  ;;  %v3849_v27 = vld [vmem:[%s4985_s30 + $0x90] sm:$0xff]  }
 0x598   : > { %v1507_v39 = vadd.f32 %v4315_v38, %v3447_v1  ;;  %v1498_v40 = vpop.f32.mrb[41].mxu1 }
 0x599   : > { %v1499_v41 = vadd.f32 %v3447_v1, %v1498_v40  ;;  %v4316_v42 = vpop.f32.mrb[42].mxu1  ;;  %4325 = vmatprep.subr.bf16.mxu0 %v1547_v30  ;;  %v3747_v40 = vunpack.c.h.bf16 %v3849_v27 }
 0x59a   : > { %v1510_v43 = vadd.f32 %v4316_v42, %v3447_v1  ;;  %v1501_v44 = vpop.f32.mrb[43].mxu1  ;;  %4326 = vmatpush3.bf16.msra.mxu0 %v1547_v30  ;;  %v1539_v46 = vmax.f32 %v1507_v39, 0.0  ;;  %v3751_v30 = vunpack.c.h.bf16 %v3850_v25  ;;  %v3746_v39 = vunpack.c.l.bf16 %v3849_v27 }
 0x59b   : > { %v1502_v45 = vadd.f32 %v3447_v1, %v1501_v44  ;;  %4327 = vmatprep.subr.bf16.mxu0 %v1548_v29  ;;  %v1537_v48 = vmax.f32 %v1499_v41, 0.0 }
 0x59c   : > { %v1540_v47 = vmax.f32 %v1510_v43, 0.0 }
 0x59d   : > { %v1538_v49 = vmax.f32 %v1502_v45, 0.0 }
 0x59e   : > { %v1550_v50 = vpack.c.bf16 %v1540_v47, %v1539_v46  ;;  %4328 = vmatpush3.bf16.msra.mxu0 %v1548_v29  ;;  %v3750_v29 = vunpack.c.l.bf16 %v3850_v25 }
 0x59f   : > { %v1549_v51 = vpack.c.bf16 %v1538_v49, %v1537_v48  ;;  %v4319_v52 = vpop.f32.mrb[44].mxu1  ;;  %v3852_v48 = vld [vmem:[%s4985_s30 + $0xa8] sm:$0xff]  }
 0x5a0   : > { %v1523_v53 = vadd.f32 %v4319_v52, %v3447_v1  ;;  %v1514_v54 = vpop.f32.mrb[45].mxu1  ;;  %v3758_v52 = vunpack.c.l.bf16 %v3852_v48 }
 0x5a1   : > { %v1515_v55 = vadd.f32 %v3447_v1, %v1514_v54  ;;  %v4320_v57 = vpop.f32.mrb[46].mxu1  ;;  %4329 = vmatprep.subr.bf16.mxu0 %v1549_v51 }
 0x5a2   : > { %v1526_v58 = vadd.f32 %v4320_v57, %v3447_v1  ;;  %v1517_v56 = vpop.f32.mrb[47].mxu1  ;;  %4330 = vmatpush3.bf16.msra.mxu0 %v1549_v51  ;;  %v1543_v16 = vmax.f32 %v1523_v53, 0.0  ;;  %v3759_v53 = vunpack.c.h.bf16 %v3852_v48 }
 0x5a3   : > { %v1518_v59 = vadd.f32 %v3447_v1, %v1517_v56  ;;  %4331 = vmatprep.subr.bf16.mxu0 %v1550_v50  ;;  %v1541_v61 = vmax.f32 %v1515_v55, 0.0  ;;  %v5124_v1 = vld [vmem:[%s4907_s20 + $0x38] sm:$0xff]  }
 0x5a4   : > { %v1544_v60 = vmax.f32 %v1526_v58, 0.0 }
 0x5a5   : > { %v1542_v31 = vmax.f32 %v1518_v59, 0.0 }
 0x5a6   : > { %v1552_v32 = vpack.c.bf16 %v1544_v60, %v1543_v16  ;;  %4332 = vmatpush3.bf16.msra.mxu0 %v1550_v50  ;;  %v3851_v50 = vld [vmem:[%s4985_s30 + $0xa0] sm:$0xff]  }
 0x5a7   : > { %v1551_v33 = vpack.c.bf16 %v1542_v31, %v1541_v61  ;;  %v3754_v55 = vunpack.c.l.bf16 %v3851_v50  ;;  %v3755_v57 = vunpack.c.h.bf16 %v3851_v50 }
 0x5a9   : > { %4333 = vmatprep.subr.bf16.mxu0 %v1551_v33 }
 0x5aa   : > { %4334 = vmatpush3.bf16.msra.mxu0 %v1551_v33 }
 0x5ab   : > { %4335 = vmatprep.subr.bf16.mxu0 %v1552_v32 }
 0x5ae   : > { %4336 = vmatpush3.bf16.msra.mxu0 %v1552_v32  ;;  %v3854_v32 = vld [vmem:[%s4985_s30 + $0xb8] sm:$0xff]  }
 0x5af   : > { %4385 = vmatprep.subr.bf16.mxu0 %v4711_v4 }
 0x5b1   : > { %4338 = vmatmul.mubr.bf16.vlgmr.msra.gmra.mrb[48].mxu0 %v5100_v34 }
 0x5b2   : > { %4341 = vmatprep.mubr.bf16.mxu0 %v5104_v35  ;;  %4386 = vmatpush3.bf16.msra.mxu0 %v4711_v4  ;;  %v3766_v4 = vunpack.c.l.bf16 %v3854_v32 }
 0x5b3   : > { %4387 = vmatprep.subr.bf16.mxu0 %v4712_v5 }
 0x5b6   : > { %4388 = vmatpush3.bf16.msra.mxu0 %v4712_v5  ;;  %v3767_v5 = vunpack.c.h.bf16 %v3854_v32 }
 0x5b7   : > { %4389 = vmatprep.subr.bf16.mxu0 %v4713_v6 }
 0x5b9   : > { %4342 = vmatmul.mubr.bf16.gmra.mrb[52].mxu0 %v5108_v36 }
 0x5ba   : > { %4345 = vmatprep.mubr.bf16.mxu0 %v5112_v37  ;;  %4390 = vmatpush3.bf16.msra.mxu0 %v4713_v6 }
 0x5bb   : > { %4391 = vmatprep.subr.bf16.mxu0 %v4714_v7 }
 0x5be   : > { %4392 = vmatpush3.bf16.msra.mxu0 %v4714_v7  ;;  %v3762_v7 = vunpack.c.l.bf16 %v3853_v2 }
 0x5bf   : > { %4393 = vmatprep.subr.bf16.mxu0 %v4715_v8 }
 0x5c1   : > { %4346 = vmatmul.mubr.bf16.gmra.mrb[56].mxu0 %v5116_v63 }
 0x5c2   : > { %4349 = vmatprep.mubr.bf16.mxu0 %v5120_v0  ;;  %4394 = vmatpush3.bf16.msra.mxu0 %v4715_v8  ;;  %v3763_v8 = vunpack.c.h.bf16 %v3853_v2 }
 0x5c3   : > { %4395 = vmatprep.subr.bf16.mxu0 %v4716_v9 }
 0x5c6   : > { %4396 = vmatpush3.bf16.msra.mxu0 %v4716_v9 }
 0x5c9   : > { %4350 = vmatmul.mubr.bf16.gmra.mrb[60].mxu0 %v5124_v1 }
 0x684   : > { %v4339_v14 = vpop.f32.mrb[48].mxu0 }
 0x685   : > { %v1620_v18 = vpop.f32.mrb[49].mxu0  ;;  %v1629_v20 = vadd.f32 %v4339_v14, %v3742_v12 }
 0x686   : > { %v4340_v19 = vpop.f32.mrb[50].mxu0  ;;  %v1621_v23 = vadd.f32 %v3738_v15, %v1620_v18 }
 0x687   : > { %v1632_v21 = vadd.f32 %v4340_v19, %v3743_v13  ;;  %v1623_v22 = vpop.f32.mrb[51].mxu0  ;;  %v4717_v19 = vld [vmem:[%s5375_s7 + $0xb0] sm:$0xff]  }
 0x688   : > { %v1624_v24 = vadd.f32 %v3739_v17, %v1623_v22  ;;  %4397 = vmatprep.subr.bf16.mxu0 %v4717_v19 }
 0x689   : > { %v1684_v26 = vpack.c.bf16 %v1632_v21, %v1629_v20  ;;  %4398 = vmatpush3.bf16.msra.mxu0 %v4717_v19  ;;  %v4718_v20 = vld [vmem:[%s5375_s7 + $0xb8] sm:$0xff]   ;;  %v3489_v21 = vld [vmem:[%s5374_s6 + $0x2] ss:$0 sm:$0xff] }
 0x68a   : > { %v1683_v28 = vpack.c.bf16 %v1624_v24, %v1621_v23  ;;  %4399 = vmatprep.subr.bf16.mxu0 %v4718_v20 }
 0x68c   : > { %v4343_v38 = vpop.f32.mrb[52].mxu0  ;;  %4369 = vmatprep.mubr.bf16.mxu1 %v1683_v28 }
 0x68d   : > { %v1636_v41 = vpop.f32.mrb[53].mxu0  ;;  %4370 = vmatmul.mubr.bf16.vlgmr.msra.gmra.mrb[48].mxu1 %v1684_v26  ;;  %v1645_v43 = vadd.f32 %v4343_v38, %v3750_v29  ;;  %4400 = vmatpush3.bf16.msra.mxu0 %v4718_v20 }
 0x68e   : > { %v4344_v42 = vpop.f32.mrb[54].mxu0  ;;  %v1637_v46 = vadd.f32 %v3746_v39, %v1636_v41 }
 0x68f   : > { %v1648_v44 = vadd.f32 %v4344_v42, %v3751_v30  ;;  %v1639_v45 = vpop.f32.mrb[55].mxu0 }
 0x690   : > { %v1640_v47 = vadd.f32 %v3747_v40, %v1639_v45 }
 0x691   : > { %v1686_v49 = vpack.c.bf16 %v1648_v44, %v1645_v43 }
 0x692   : > { %v1685_v51 = vpack.c.bf16 %v1640_v47, %v1637_v46 }
 0x694   : > { %v4347_v54 = vpop.f32.mrb[56].mxu0  ;;  %4373 = vmatprep.mubr.bf16.mxu1 %v1685_v51 }
 0x695   : > { %v1652_v58 = vpop.f32.mrb[57].mxu0  ;;  %4374 = vmatmul.mubr.bf16.gmra.mrb[52].mxu1 %v1686_v49  ;;  %v1661_v59 = vadd.f32 %v4347_v54, %v3758_v52 }
 0x696   : > { %v4348_v56 = vpop.f32.mrb[58].mxu0  ;;  %v1653_v61 = vadd.f32 %v3754_v55, %v1652_v58 }
 0x697   : > { %v1664_v16 = vadd.f32 %v4348_v56, %v3759_v53  ;;  %v1655_v60 = vpop.f32.mrb[59].mxu0 }
 0x698   : > { %v1656_v31 = vadd.f32 %v3755_v57, %v1655_v60 }
 0x699   : > { %v1688_v33 = vpack.c.bf16 %v1664_v16, %v1661_v59 }
 0x69a   : > { %v1687_v3 = vpack.c.bf16 %v1656_v31, %v1653_v61 }
 0x69c   : > { %v4351_v6 = vpop.f32.mrb[60].mxu0  ;;  %4377 = vmatprep.mubr.bf16.mxu1 %v1687_v3 }
 0x69d   : > { %v1668_v9 = vpop.f32.mrb[61].mxu0  ;;  %4378 = vmatmul.mubr.bf16.gmra.mrb[56].mxu1 %v1688_v33  ;;  %v1677_v11 = vadd.f32 %v4351_v6, %v3766_v4 }
 0x69e   : > { %v4352_v10 = vpop.f32.mrb[62].mxu0  ;;  %v1669_v14 = vadd.f32 %v3762_v7, %v1668_v9 }
 0x69f   : > { %v1680_v12 = vadd.f32 %v4352_v10, %v3767_v5  ;;  %v1671_v13 = vpop.f32.mrb[63].mxu0 }
 0x6a0   : > { %v1672_v15 = vadd.f32 %v3763_v8, %v1671_v13 }
 0x6a1   : > { %v1690_v17 = vpack.c.bf16 %v1680_v12, %v1677_v11 }
 0x6a2   : > { %v1689_v18 = vpack.c.bf16 %v1672_v15, %v1669_v14 }
 0x6a4   : > { %4381 = vmatprep.mubr.bf16.mxu1 %v1689_v18 }
 0x6a5   : > { %4382 = vmatmul.mubr.bf16.gmra.mrb[60].mxu1 %v1690_v17 }
 0x6a6   : > { %4433 = vmatprep.mubr.bf16.mxu1 %v5066_v62 }
 0x760   : > { %v4371_v22 = vpop.f32.mrb[48].mxu1 }
 0x761   : > { %v1807_v23 = vadd.f32 %v4371_v22, %v3489_v21  ;;  %v1798_v24 = vpop.f32.mrb[49].mxu1  ;;  %v4719_v22 = vld [vmem:[%s5373_s5 + $0xc0] sm:$0xff]  }
 0x762   : > { %v1799_v62 = vadd.f32 %v3489_v21, %v1798_v24  ;;  %v4372_v25 = vpop.f32.mrb[50].mxu1  ;;  %4449 = vmatprep.subr.bf16.mxu0 %v4719_v22  ;;  %v4722_v24 = vld [vmem:[%s5373_s5 + $0xd8] sm:$0xff]  }
 0x763   : > { %v1810_v26 = vadd.f32 %v4372_v25, %v3489_v21  ;;  %v1801_v27 = vpop.f32.mrb[51].mxu1  ;;  %v1863_v29 = vmax.f32 %v1807_v23, 0.0  ;;  %v4720_v23 = vld [vmem:[%s5373_s5 + $0xc8] sm:$0xff]  }
 0x764   : > { %v1802_v28 = vadd.f32 %v3489_v21, %v1801_v27  ;;  %v1861_v38 = vmax.f32 %v1799_v62, 0.0  ;;  %v4723_v62 = vld [vmem:[%s5373_s5 + $0xe0] sm:$0xff]   ;;  %v4724_v25 = vld [vmem:[%s5373_s5 + $0xe8] sm:$0xff]  }
 0x765   : > { %v1864_v30 = vmax.f32 %v1810_v26, 0.0  ;;  %v3515_v26 = vld [vmem:[%s5376_s8 + $0x2] ss:$0 sm:$0xff] }
 0x766   : > { %v1862_v39 = vmax.f32 %v1802_v28, 0.0 }
 0x767   : > { %v1878_v40 = vpack.c.bf16 %v1864_v30, %v1863_v29 }
 0x768   : > { %v1877_v41 = vpack.c.bf16 %v1862_v39, %v1861_v38  ;;  %v4375_v42 = vpop.f32.mrb[52].mxu1 }
 0x769   : > { %v1823_v43 = vadd.f32 %v4375_v42, %v3489_v21  ;;  %v1814_v44 = vpop.f32.mrb[53].mxu1 }
 0x76a   : > { %v1815_v45 = vadd.f32 %v3489_v21, %v1814_v44  ;;  %v4376_v46 = vpop.f32.mrb[54].mxu1  ;;  %4401 = vmatprep.mubr.bf16.mxu0 %v1877_v41 }
 0x76b   : > { %v1826_v47 = vadd.f32 %v4376_v46, %v3489_v21  ;;  %v1817_v48 = vpop.f32.mrb[55].mxu1  ;;  %4402 = vmatmul.mubr.bf16.vlgmr.msra.gmra.mrb[64].mxu0 %v1878_v40  ;;  %v1867_v50 = vmax.f32 %v1823_v43, 0.0 }
 0x76c   : > { %v1818_v49 = vadd.f32 %v3489_v21, %v1817_v48  ;;  %v1865_v52 = vmax.f32 %v1815_v45, 0.0  ;;  %4450 = vmatpush3.bf16.msra.mxu0 %v4719_v22 }
 0x76d   : > { %v1868_v51 = vmax.f32 %v1826_v47, 0.0  ;;  %4451 = vmatprep.subr.bf16.mxu0 %v4720_v23 }
 0x76e   : > { %v1866_v53 = vmax.f32 %v1818_v49, 0.0 }
 0x76f   : > { %v1880_v54 = vpack.c.bf16 %v1868_v51, %v1867_v50 }
 0x770   : > { %v1879_v55 = vpack.c.bf16 %v1866_v53, %v1865_v52  ;;  %v4379_v57 = vpop.f32.mrb[56].mxu1  ;;  %4452 = vmatpush3.bf16.msra.mxu0 %v4720_v23 }
 0x771   : > { %v1839_v58 = vadd.f32 %v4379_v57, %v3489_v21  ;;  %v1830_v56 = vpop.f32.mrb[57].mxu1 }
 0x772   : > { %v1831_v59 = vadd.f32 %v3489_v21, %v1830_v56  ;;  %v4380_v16 = vpop.f32.mrb[58].mxu1  ;;  %4405 = vmatprep.mubr.bf16.mxu0 %v1879_v55 }
 0x773   : > { %v1842_v60 = vadd.f32 %v4380_v16, %v3489_v21  ;;  %v1833_v61 = vpop.f32.mrb[59].mxu1  ;;  %4406 = vmatmul.mubr.bf16.gmra.mrb[68].mxu0 %v1880_v54  ;;  %v1871_v32 = vmax.f32 %v1839_v58, 0.0 }
 0x774   : > { %v1834_v31 = vadd.f32 %v3489_v21, %v1833_v61  ;;  %v1869_v2 = vmax.f32 %v1831_v59, 0.0 }
 0x775   : > { %v1872_v33 = vmax.f32 %v1842_v60, 0.0 }
 0x776   : > { %v1870_v3 = vmax.f32 %v1834_v31, 0.0 }
 0x777   : > { %v1882_v4 = vpack.c.bf16 %v1872_v33, %v1871_v32 }
 0x778   : > { %v1881_v5 = vpack.c.bf16 %v1870_v3, %v1869_v2  ;;  %v4383_v6 = vpop.f32.mrb[60].mxu1 }
 0x779   : > { %v1855_v7 = vadd.f32 %v4383_v6, %v3489_v21  ;;  %v1846_v8 = vpop.f32.mrb[61].mxu1 }
 0x77a   : > { %v1847_v9 = vadd.f32 %v3489_v21, %v1846_v8  ;;  %v4384_v10 = vpop.f32.mrb[62].mxu1  ;;  %4409 = vmatprep.mubr.bf16.mxu0 %v1881_v5 }
 0x77b   : > { %v1858_v11 = vadd.f32 %v4384_v10, %v3489_v21  ;;  %v1849_v12 = vpop.f32.mrb[63].mxu1  ;;  %4410 = vmatmul.mubr.bf16.gmra.mrb[72].mxu0 %v1882_v4  ;;  %v1875_v14 = vmax.f32 %v1855_v7, 0.0 }
 0x77c   : > { %v1850_v13 = vadd.f32 %v3489_v21, %v1849_v12  ;;  %v1873_v17 = vmax.f32 %v1847_v9, 0.0  ;;  %v4721_v21 = vld [vmem:[%s5373_s5 + $0xd0] sm:$0xff]  }
 0x77d   : > { %v1876_v15 = vmax.f32 %v1858_v11, 0.0  ;;  %4453 = vmatprep.subr.bf16.mxu0 %v4721_v21 }
 0x77e   : > { %v1874_v18 = vmax.f32 %v1850_v13, 0.0  ;;  %4454 = vmatpush3.bf16.msra.mxu0 %v4721_v21 }
 0x77f   : > { %v1884_v19 = vpack.c.bf16 %v1876_v15, %v1875_v14  ;;  %4455 = vmatprep.subr.bf16.mxu0 %v4722_v24 }
 0x780   : > { %v1883_v20 = vpack.c.bf16 %v1874_v18, %v1873_v17 }
 0x782   : > { %4413 = vmatprep.mubr.bf16.mxu0 %v1883_v20  ;;  %4456 = vmatpush3.bf16.msra.mxu0 %v4722_v24 }
 0x783   : > { %4414 = vmatmul.mubr.bf16.gmra.mrb[76].mxu0 %v1884_v19  ;;  %4457 = vmatprep.subr.bf16.mxu0 %v4723_v62 }
 0x786   : > { %4458 = vmatpush3.bf16.msra.mxu0 %v4723_v62 }
 0x787   : > { %4459 = vmatprep.subr.bf16.mxu0 %v4724_v25 }
 0x78a   : > { %4460 = vmatpush3.bf16.msra.mxu0 %v4724_v25 }
 0x83e   : > { %v4403_v27 = vpop.f32.mrb[64].mxu0 }
 0x83f   : > { %v2001_v28 = vadd.f32 %v4403_v27, %v3515_v26  ;;  %v1992_v29 = vpop.f32.mrb[65].mxu0  ;;  %v3856_v27 = vld [vmem:[%s4985_s30 + $0xc8] sm:$0xff]  }
 0x840   : > { %v1993_v30 = vadd.f32 %v3515_v26, %v1992_v29  ;;  %v4404_v38 = vpop.f32.mrb[66].mxu0  ;;  %v3774_v29 = vunpack.c.l.bf16 %v3856_v27 }
 0x841   : > { %v2004_v39 = vadd.f32 %v4404_v38, %v3515_v26  ;;  %v1995_v40 = vpop.f32.mrb[67].mxu0  ;;  %v2057_v42 = vmax.f32 %v2001_v28, 0.0  ;;  %v3855_v28 = vld [vmem:[%s4985_s30 + $0xc0] sm:$0xff]  }
 0x842   : > { %v1996_v41 = vadd.f32 %v3515_v26, %v1995_v40  ;;  %v2055_v44 = vmax.f32 %v1993_v30, 0.0  ;;  %v3775_v30 = vunpack.c.h.bf16 %v3856_v27  ;;  %v3771_v40 = vunpack.c.h.bf16 %v3855_v28  ;;  %v4769_v27 = vld [vmem:[%s4907_s20] sm:$0xff]  }
 0x843   : > { %v2058_v43 = vmax.f32 %v2004_v39, 0.0  ;;  %v3770_v39 = vunpack.c.l.bf16 %v3855_v28  ;;  %v4733_v28 = vld [vmem:[%s5375_s7 + $0xf0] sm:$0xff]  }
 0x844   : > { %v2056_v45 = vmax.f32 %v1996_v41, 0.0 }
 0x845   : > { %v2072_v46 = vpack.c.bf16 %v2058_v43, %v2057_v42 }
 0x846   : > { %v2071_v47 = vpack.c.bf16 %v2056_v45, %v2055_v44  ;;  %v4407_v48 = vpop.f32.mrb[68].mxu0 }
 0x847   : > { %v2017_v49 = vadd.f32 %v4407_v48, %v3515_v26  ;;  %v2008_v50 = vpop.f32.mrb[69].mxu0  ;;  %v3858_v48 = vld [vmem:[%s4985_s30 + $0xd8] sm:$0xff]  }
 0x848   : > { %v2009_v51 = vadd.f32 %v3515_v26, %v2008_v50  ;;  %v4408_v52 = vpop.f32.mrb[70].mxu0  ;;  %4417 = vmatprep.subr.bf16.mxu1 %v2071_v47  ;;  %v3857_v50 = vld [vmem:[%s4985_s30 + $0xd0] sm:$0xff]  }
 0x849   : > { %v2020_v53 = vadd.f32 %v4408_v52, %v3515_v26  ;;  %v2011_v54 = vpop.f32.mrb[71].mxu0  ;;  %4418 = vmatpush3.bf16.msra.mxu1 %v2071_v47  ;;  %v2061_v57 = vmax.f32 %v2017_v49, 0.0  ;;  %v3782_v52 = vunpack.c.l.bf16 %v3858_v48 }
 0x84a   : > { %v2012_v55 = vadd.f32 %v3515_v26, %v2011_v54  ;;  %4419 = vmatprep.subr.bf16.mxu1 %v2072_v46  ;;  %v2059_v56 = vmax.f32 %v2009_v51, 0.0 }
 0x84b   : > { %v2062_v58 = vmax.f32 %v2020_v53, 0.0  ;;  %v3783_v53 = vunpack.c.h.bf16 %v3858_v48 }
 0x84c   : > { %v2060_v59 = vmax.f32 %v2012_v55, 0.0  ;;  %v3778_v55 = vunpack.c.l.bf16 %v3857_v50 }
 0x84d   : > { %v2074_v16 = vpack.c.bf16 %v2062_v58, %v2061_v57  ;;  %4420 = vmatpush3.bf16.msra.mxu1 %v2072_v46  ;;  %v3779_v57 = vunpack.c.h.bf16 %v3857_v50 }
 0x84e   : > { %v2073_v60 = vpack.c.bf16 %v2060_v59, %v2059_v56  ;;  %v4411_v61 = vpop.f32.mrb[72].mxu0 }
 0x84f   : > { %v2033_v31 = vadd.f32 %v4411_v61, %v3515_v26  ;;  %v2024_v32 = vpop.f32.mrb[73].mxu0 }
 0x850   : > { %v2025_v33 = vadd.f32 %v3515_v26, %v2024_v32  ;;  %v4412_v2 = vpop.f32.mrb[74].mxu0  ;;  %4421 = vmatprep.subr.bf16.mxu1 %v2073_v60  ;;  %v3860_v32 = vld [vmem:[%s4985_s30 + $0xe8] sm:$0xff]  }
 0x851   : > { %v2036_v3 = vadd.f32 %v4412_v2, %v3515_v26  ;;  %v2027_v4 = vpop.f32.mrb[75].mxu0  ;;  %4422 = vmatpush3.bf16.msra.mxu1 %v2073_v60  ;;  %v2065_v6 = vmax.f32 %v2033_v31, 0.0  ;;  %v3859_v2 = vld [vmem:[%s4985_s30 + $0xe0] sm:$0xff]  }
 0x852   : > { %v2028_v5 = vadd.f32 %v3515_v26, %v2027_v4  ;;  %4423 = vmatprep.subr.bf16.mxu1 %v2074_v16  ;;  %v2063_v8 = vmax.f32 %v2025_v33, 0.0  ;;  %v3790_v4 = vunpack.c.l.bf16 %v3860_v32 }
 0x853   : > { %v2066_v7 = vmax.f32 %v2036_v3, 0.0 }
 0x854   : > { %v2064_v9 = vmax.f32 %v2028_v5, 0.0  ;;  %v3791_v5 = vunpack.c.h.bf16 %v3860_v32 }
 0x855   : > { %v2076_v10 = vpack.c.bf16 %v2066_v7, %v2065_v6  ;;  %4424 = vmatpush3.bf16.msra.mxu1 %v2074_v16  ;;  %v3786_v7 = vunpack.c.l.bf16 %v3859_v2 }
 0x856   : > { %v2075_v11 = vpack.c.bf16 %v2064_v9, %v2063_v8  ;;  %v4415_v12 = vpop.f32.mrb[76].mxu0  ;;  %v3787_v8 = vunpack.c.h.bf16 %v3859_v2 }
 0x857   : > { %v2049_v13 = vadd.f32 %v4415_v12, %v3515_v26  ;;  %v2040_v14 = vpop.f32.mrb[77].mxu0 }
 0x858   : > { %v2041_v15 = vadd.f32 %v3515_v26, %v2040_v14  ;;  %v4416_v17 = vpop.f32.mrb[78].mxu0  ;;  %4425 = vmatprep.subr.bf16.mxu1 %v2075_v11 }
 0x859   : > { %v2052_v18 = vadd.f32 %v4416_v17, %v3515_v26  ;;  %v2043_v19 = vpop.f32.mrb[79].mxu0  ;;  %4426 = vmatpush3.bf16.msra.mxu1 %v2075_v11  ;;  %v2069_v22 = vmax.f32 %v2049_v13, 0.0  ;;  %v3862_v17 = vld [vmem:[%s4985_s30 + $0xf8] sm:$0xff]  }
 0x85a   : > { %v2044_v20 = vadd.f32 %v3515_v26, %v2043_v19  ;;  %4427 = vmatprep.subr.bf16.mxu1 %v2076_v10  ;;  %v2067_v21 = vmax.f32 %v2041_v15, 0.0  ;;  %v4725_v26 = vld [vmem:[%s5373_s5 + $0xf0] sm:$0xff]  }
 0x85b   : > { %v2070_v23 = vmax.f32 %v2052_v18, 0.0  ;;  %4461 = vmatprep.subr.bf16.mxu0 %v4725_v26  ;;  %v3861_v19 = vld [vmem:[%s4985_s30 + $0xf0] sm:$0xff]  }
 0x85c   : > { %v2068_v24 = vmax.f32 %v2044_v20, 0.0  ;;  %4462 = vmatpush3.bf16.msra.mxu0 %v4725_v26 }
 0x85d   : > { %v2078_v62 = vpack.c.bf16 %v2070_v23, %v2069_v22  ;;  %4428 = vmatpush3.bf16.msra.mxu1 %v2076_v10  ;;  %v3798_v22 = vunpack.c.l.bf16 %v3862_v17  ;;  %v3799_v23 = vunpack.c.h.bf16 %v3862_v17 }
 0x85e   : > { %v2077_v25 = vpack.c.bf16 %v2068_v24, %v2067_v21  ;;  %v3794_v24 = vunpack.c.l.bf16 %v3861_v19 }
 0x860   : > { %4429 = vmatprep.subr.bf16.mxu1 %v2077_v25 }
 0x861   : > { %4430 = vmatpush3.bf16.msra.mxu1 %v2077_v25 }
 0x862   : > { %4431 = vmatprep.subr.bf16.mxu1 %v2078_v62 }
 0x865   : > { %4432 = vmatpush3.bf16.msra.mxu1 %v2078_v62  ;;  %v3795_v62 = vunpack.c.h.bf16 %v3861_v19 }
 0x868   : > { %4434 = vmatmul.mubr.bf16.vlgmr.msra.gmra.mrb[64].mxu1 %v5100_v34  ;;  %v4726_v34 = vld [vmem:[%s5373_s5 + $0xf8] sm:$0xff]  }
 0x869   : > { %4437 = vmatprep.mubr.bf16.mxu1 %v5104_v35  ;;  %4463 = vmatprep.subr.bf16.mxu0 %v4726_v34  ;;  %v4727_v35 = vld [vmem:[%s5375_s7 + $0xc0] sm:$0xff]  }
 0x86a   : > { %4464 = vmatpush3.bf16.msra.mxu0 %v4726_v34  ;;  %4481 = vmatprep.subr.bf16.mxu1 %v4727_v35 }
 0x86b   : > { %4482 = vmatpush3.bf16.msra.mxu1 %v4727_v35 }
 0x870   : > { %4438 = vmatmul.mubr.bf16.gmra.mrb[68].mxu1 %v5108_v36  ;;  %v4728_v36 = vld [vmem:[%s5375_s7 + $0xc8] sm:$0xff]  }
 0x871   : > { %4441 = vmatprep.mubr.bf16.mxu1 %v5112_v37  ;;  %4483 = vmatprep.subr.bf16.mxu1 %v4728_v36  ;;  %v4729_v37 = vld [vmem:[%s5375_s7 + $0xd0] sm:$0xff]  }
 0x872   : > { %4484 = vmatpush3.bf16.msra.mxu1 %v4728_v36 }
 0x873   : > { %4485 = vmatprep.subr.bf16.mxu1 %v4729_v37 }
 0x876   : > { %4486 = vmatpush3.bf16.msra.mxu1 %v4729_v37 }
 0x878   : > { %4442 = vmatmul.mubr.bf16.gmra.mrb[72].mxu1 %v5116_v63  ;;  %v4730_v63 = vld [vmem:[%s5375_s7 + $0xd8] sm:$0xff]  }
 0x879   : > { %4445 = vmatprep.mubr.bf16.mxu1 %v5120_v0  ;;  %4487 = vmatprep.subr.bf16.mxu1 %v4730_v63  ;;  %v4731_v0 = vld [vmem:[%s5375_s7 + $0xe0] sm:$0xff]  }
 0x87a   : > { %4488 = vmatpush3.bf16.msra.mxu1 %v4730_v63 }
 0x87b   : > { %4489 = vmatprep.subr.bf16.mxu1 %v4731_v0 }
 0x87e   : > { %4490 = vmatpush3.bf16.msra.mxu1 %v4731_v0 }
 0x880   : > { %4446 = vmatmul.mubr.bf16.gmra.mrb[76].mxu1 %v5124_v1  ;;  %v4732_v1 = vld [vmem:[%s5375_s7 + $0xe8] sm:$0xff]  }
 0x881   : > { %4491 = vmatprep.subr.bf16.mxu1 %v4732_v1 }
 0x882   : > { %4492 = vmatpush3.bf16.msra.mxu1 %v4732_v1 }
 0x883   : > { %4493 = vmatprep.subr.bf16.mxu1 %v4733_v28 }
 0x886   : > { %4494 = vmatpush3.bf16.msra.mxu1 %v4733_v28  ;;  %v4740_v28 = vld [vmem:[%s5373_s5 + $0x128] sm:$0xff]  }
 0x93b   : > { %v4435_v38 = vpop.f32.mrb[64].mxu1 }
 0x93c   : > { %v2146_v41 = vpop.f32.mrb[65].mxu1  ;;  %v2155_v43 = vadd.f32 %v4435_v38, %v3774_v29  ;;  %v4734_v29 = vld [vmem:[%s5375_s7 + $0xf8] sm:$0xff]  }
 0x93d   : > { %v4436_v42 = vpop.f32.mrb[66].mxu1  ;;  %v2147_v46 = vadd.f32 %v3770_v39, %v2146_v41  ;;  %4495 = vmatprep.subr.bf16.mxu1 %v4734_v29 }
 0x93e   : > { %v2158_v44 = vadd.f32 %v4436_v42, %v3775_v30  ;;  %v2149_v45 = vpop.f32.mrb[67].mxu1  ;;  %4496 = vmatpush3.bf16.msra.mxu1 %v4734_v29  ;;  %v3557_v30 = vld [vmem:[%s5374_s6 + $0x3] ss:$0 sm:$0xff] }
 0x93f   : > { %v2150_v47 = vadd.f32 %v3771_v40, %v2149_v45  ;;  %v3583_v29 = vld [vmem:[%s5376_s8 + $0x3] ss:$0 sm:$0xff] }
 0x940   : > { %v2210_v49 = vpack.c.bf16 %v2158_v44, %v2155_v43 }
 0x941   : > { %v2209_v51 = vpack.c.bf16 %v2150_v47, %v2147_v46 }
 0x943   : > { %v4439_v54 = vpop.f32.mrb[68].mxu1  ;;  %4465 = vmatprep.mubr.bf16.mxu0 %v2209_v51 }
 0x944   : > { %v2162_v58 = vpop.f32.mrb[69].mxu1  ;;  %4466 = vmatmul.mubr.bf16.vlgmr.msra.gmra.mrb[80].mxu0 %v2210_v49  ;;  %v2171_v59 = vadd.f32 %v4439_v54, %v3782_v52 }
 0x945   : > { %v4440_v56 = vpop.f32.mrb[70].mxu1  ;;  %v2163_v61 = vadd.f32 %v3778_v55, %v2162_v58 }
 0x946   : > { %v2174_v16 = vadd.f32 %v4440_v56, %v3783_v53  ;;  %v2165_v60 = vpop.f32.mrb[71].mxu1 }
 0x947   : > { %v2166_v31 = vadd.f32 %v3779_v57, %v2165_v60 }
 0x948   : > { %v2212_v33 = vpack.c.bf16 %v2174_v16, %v2171_v59 }
 0x949   : > { %v2211_v3 = vpack.c.bf16 %v2166_v31, %v2163_v61 }
 0x94b   : > { %v4443_v6 = vpop.f32.mrb[72].mxu1  ;;  %4469 = vmatprep.mubr.bf16.mxu0 %v2211_v3 }
 0x94c   : > { %v2178_v9 = vpop.f32.mrb[73].mxu1  ;;  %4470 = vmatmul.mubr.bf16.gmra.mrb[84].mxu0 %v2212_v33  ;;  %v2187_v11 = vadd.f32 %v4443_v6, %v3790_v4 }
 0x94d   : > { %v4444_v10 = vpop.f32.mrb[74].mxu1  ;;  %v2179_v14 = vadd.f32 %v3786_v7, %v2178_v9 }
 0x94e   : > { %v2190_v12 = vadd.f32 %v4444_v10, %v3791_v5  ;;  %v2181_v13 = vpop.f32.mrb[75].mxu1 }
 0x94f   : > { %v2182_v15 = vadd.f32 %v3787_v8, %v2181_v13 }
 0x950   : > { %v2214_v18 = vpack.c.bf16 %v2190_v12, %v2187_v11 }
 0x951   : > { %v2213_v20 = vpack.c.bf16 %v2182_v15, %v2179_v14 }
 0x953   : > { %v4447_v21 = vpop.f32.mrb[76].mxu1  ;;  %4473 = vmatprep.mubr.bf16.mxu0 %v2213_v20 }
 0x954   : > { %v2194_v25 = vpop.f32.mrb[77].mxu1  ;;  %4474 = vmatmul.mubr.bf16.gmra.mrb[88].mxu0 %v2214_v18  ;;  %v2203_v34 = vadd.f32 %v4447_v21, %v3798_v22 }
 0x955   : > { %v4448_v26 = vpop.f32.mrb[78].mxu1  ;;  %v2195_v37 = vadd.f32 %v3794_v24, %v2194_v25 }
 0x956   : > { %v2206_v35 = vadd.f32 %v4448_v26, %v3799_v23  ;;  %v2197_v36 = vpop.f32.mrb[79].mxu1 }
 0x957   : > { %v2198_v63 = vadd.f32 %v3795_v62, %v2197_v36 }
 0x958   : > { %v2216_v0 = vpack.c.bf16 %v2206_v35, %v2203_v34 }
 0x959   : > { %v2215_v1 = vpack.c.bf16 %v2198_v63, %v2195_v37  ;;  %v4735_v37 = vld [vmem:[%s5373_s5 + $0x100] sm:$0xff]   ;;  %v4736_v63 = vld [vmem:[%s5373_s5 + $0x108] sm:$0xff]  }
 0x95a   : > { %4545 = vmatprep.subr.bf16.mxu1 %v4735_v37 }
 0x95b   : > { %4477 = vmatprep.mubr.bf16.mxu0 %v2215_v1  ;;  %v4738_v1 = vld [vmem:[%s5373_s5 + $0x118] sm:$0xff]  }
 0x95c   : > { %4478 = vmatmul.mubr.bf16.gmra.mrb[92].mxu0 %v2216_v0  ;;  %v4737_v0 = vld [vmem:[%s5373_s5 + $0x110] sm:$0xff]  }
 0x95d   : > { %4529 = vmatprep.mubr.bf16.mxu0 %v4769_v27  ;;  %v4739_v27 = vld [vmem:[%s5373_s5 + $0x120] sm:$0xff]  }
 0xa17   : > { %v4467_v38 = vpop.f32.mrb[80].mxu0 }
 0xa18   : > { %v2333_v39 = vadd.f32 %v4467_v38, %v3557_v30  ;;  %v2324_v40 = vpop.f32.mrb[81].mxu0 }
 0xa19   : > { %v2325_v41 = vadd.f32 %v3557_v30, %v2324_v40  ;;  %v4468_v42 = vpop.f32.mrb[82].mxu0 }
 0xa1a   : > { %v2336_v43 = vadd.f32 %v4468_v42, %v3557_v30  ;;  %v2327_v44 = vpop.f32.mrb[83].mxu0  ;;  %v2389_v46 = vmax.f32 %v2333_v39, 0.0 }
 0xa1b   : > { %v2328_v45 = vadd.f32 %v3557_v30, %v2327_v44  ;;  %v2387_v48 = vmax.f32 %v2325_v41, 0.0 }
 0xa1c   : > { %v2390_v47 = vmax.f32 %v2336_v43, 0.0 }
 0xa1d   : > { %v2388_v49 = vmax.f32 %v2328_v45, 0.0 }
 0xa1e   : > { %v2404_v50 = vpack.c.bf16 %v2390_v47, %v2389_v46 }
 0xa1f   : > { %v2403_v51 = vpack.c.bf16 %v2388_v49, %v2387_v48  ;;  %v4471_v52 = vpop.f32.mrb[84].mxu0 }
 0xa20   : > { %v2349_v53 = vadd.f32 %v4471_v52, %v3557_v30  ;;  %v2340_v54 = vpop.f32.mrb[85].mxu0 }
 0xa21   : > { %v2341_v55 = vadd.f32 %v3557_v30, %v2340_v54  ;;  %v4472_v57 = vpop.f32.mrb[86].mxu0  ;;  %4497 = vmatprep.mubr.bf16.mxu1 %v2403_v51 }
 0xa22   : > { %v2352_v58 = vadd.f32 %v4472_v57, %v3557_v30  ;;  %v2343_v56 = vpop.f32.mrb[87].mxu0  ;;  %4498 = vmatmul.mubr.bf16.vlgmr.msra.gmra.mrb[80].mxu1 %v2404_v50  ;;  %v2393_v16 = vmax.f32 %v2349_v53, 0.0 }
 0xa23   : > { %v2344_v59 = vadd.f32 %v3557_v30, %v2343_v56  ;;  %v2391_v61 = vmax.f32 %v2341_v55, 0.0  ;;  %4546 = vmatpush3.bf16.msra.mxu1 %v4735_v37  ;;  %v4771_v37 = vld [vmem:[%s4907_s20 + $0x10] sm:$0xff]  }
 0xa24   : > { %v2394_v60 = vmax.f32 %v2352_v58, 0.0  ;;  %4547 = vmatprep.subr.bf16.mxu1 %v4736_v63 }
 0xa25   : > { %v2392_v31 = vmax.f32 %v2344_v59, 0.0 }
 0xa26   : > { %v2406_v32 = vpack.c.bf16 %v2394_v60, %v2393_v16 }
 0xa27   : > { %v2405_v33 = vpack.c.bf16 %v2392_v31, %v2391_v61  ;;  %v4475_v2 = vpop.f32.mrb[88].mxu0  ;;  %4548 = vmatpush3.bf16.msra.mxu1 %v4736_v63  ;;  %v4772_v63 = vld [vmem:[%s4907_s20 + $0x18] sm:$0xff]  }
 0xa28   : > { %v2365_v3 = vadd.f32 %v4475_v2, %v3557_v30  ;;  %v2356_v4 = vpop.f32.mrb[89].mxu0  ;;  %4549 = vmatprep.subr.bf16.mxu1 %v4737_v0 }
 0xa29   : > { %v2357_v5 = vadd.f32 %v3557_v30, %v2356_v4  ;;  %v4476_v6 = vpop.f32.mrb[90].mxu0  ;;  %4501 = vmatprep.mubr.bf16.mxu1 %v2405_v33 }
 0xa2a   : > { %v2368_v7 = vadd.f32 %v4476_v6, %v3557_v30  ;;  %v2359_v8 = vpop.f32.mrb[91].mxu0  ;;  %4502 = vmatmul.mubr.bf16.gmra.mrb[84].mxu1 %v2406_v32  ;;  %v2397_v10 = vmax.f32 %v2365_v3, 0.0 }
 0xa2b   : > { %v2360_v9 = vadd.f32 %v3557_v30, %v2359_v8  ;;  %v2395_v12 = vmax.f32 %v2357_v5, 0.0  ;;  %4550 = vmatpush3.bf16.msra.mxu1 %v4737_v0  ;;  %v4773_v0 = vld [vmem:[%s4907_s20 + $0x20] sm:$0xff]  }
 0xa2c   : > { %v2398_v11 = vmax.f32 %v2368_v7, 0.0  ;;  %4551 = vmatprep.subr.bf16.mxu1 %v4738_v1 }
 0xa2d   : > { %v2396_v13 = vmax.f32 %v2360_v9, 0.0 }
 0xa2e   : > { %v2408_v14 = vpack.c.bf16 %v2398_v11, %v2397_v10 }
 0xa2f   : > { %v2407_v15 = vpack.c.bf16 %v2396_v13, %v2395_v12  ;;  %v4479_v17 = vpop.f32.mrb[92].mxu0  ;;  %4552 = vmatpush3.bf16.msra.mxu1 %v4738_v1  ;;  %v4774_v1 = vld [vmem:[%s4907_s20 + $0x28] sm:$0xff]  }
 0xa30   : > { %v2381_v18 = vadd.f32 %v4479_v17, %v3557_v30  ;;  %v2372_v19 = vpop.f32.mrb[93].mxu0  ;;  %4553 = vmatprep.subr.bf16.mxu1 %v4739_v27 }
 0xa31   : > { %v2373_v20 = vadd.f32 %v3557_v30, %v2372_v19  ;;  %v4480_v22 = vpop.f32.mrb[94].mxu0  ;;  %4505 = vmatprep.mubr.bf16.mxu1 %v2407_v15 }
 0xa32   : > { %v2384_v23 = vadd.f32 %v4480_v22, %v3557_v30  ;;  %v2375_v21 = vpop.f32.mrb[95].mxu0  ;;  %4506 = vmatmul.mubr.bf16.gmra.mrb[88].mxu1 %v2408_v14  ;;  %v2401_v62 = vmax.f32 %v2381_v18, 0.0 }
 0xa33   : > { %v2376_v24 = vadd.f32 %v3557_v30, %v2375_v21  ;;  %v2399_v26 = vmax.f32 %v2373_v20, 0.0  ;;  %4554 = vmatpush3.bf16.msra.mxu1 %v4739_v27  ;;  %v4775_v27 = vld [vmem:[%s4907_s20 + $0x30] sm:$0xff]  }
 0xa34   : > { %v2402_v25 = vmax.f32 %v2384_v23, 0.0  ;;  %4555 = vmatprep.subr.bf16.mxu1 %v4740_v28 }
 0xa35   : > { %v2400_v34 = vmax.f32 %v2376_v24, 0.0 }
 0xa36   : > { %v2410_v35 = vpack.c.bf16 %v2402_v25, %v2401_v62 }
 0xa37   : > { %v2409_v36 = vpack.c.bf16 %v2400_v34, %v2399_v26  ;;  %4556 = vmatpush3.bf16.msra.mxu1 %v4740_v28  ;;  %v4776_v28 = vld [vmem:[%s4907_s20 + $0x38] sm:$0xff]  }
 0xa39   : > { %4509 = vmatprep.mubr.bf16.mxu1 %v2409_v36  ;;  %v4770_v36 = vld [vmem:[%s4907_s20 + $0x8] sm:$0xff]  }
 0xa3a   : > { %4510 = vmatmul.mubr.bf16.gmra.mrb[92].mxu1 %v2410_v35 }
 0xaf5   : > { %v4499_v30 = vpop.f32.mrb[80].mxu1 }
 0xaf6   : > { %v2527_v38 = vadd.f32 %v4499_v30, %v3583_v29  ;;  %v2518_v39 = vpop.f32.mrb[81].mxu1  ;;  %v4742_v30 = vld [vmem:[%s5373_s5 + $0x138] sm:$0xff]  }
 0xaf7   : > { %v2519_v40 = vadd.f32 %v3583_v29, %v2518_v39  ;;  %v4500_v41 = vpop.f32.mrb[82].mxu1  ;;  %v4744_v39 = vld [vmem:[%s5375_s7 + $0x108] sm:$0xff]  }
 0xaf8   : > { %v2530_v42 = vadd.f32 %v4500_v41, %v3583_v29  ;;  %v2521_v43 = vpop.f32.mrb[83].mxu1  ;;  %v2583_v45 = vmax.f32 %v2527_v38, 0.0  ;;  %v4743_v38 = vld [vmem:[%s5375_s7 + $0x100] sm:$0xff]   ;;  %v4746_v41 = vld [vmem:[%s5375_s7 + $0x118] sm:$0xff]  }
 0xaf9   : > { %v2522_v44 = vadd.f32 %v3583_v29, %v2521_v43  ;;  %v2581_v47 = vmax.f32 %v2519_v40, 0.0  ;;  %v4745_v40 = vld [vmem:[%s5375_s7 + $0x110] sm:$0xff]   ;;  %v4748_v43 = vld [vmem:[%s5375_s7 + $0x128] sm:$0xff]  }
 0xafa   : > { %v2584_v46 = vmax.f32 %v2530_v42, 0.0  ;;  %v4747_v42 = vld [vmem:[%s5375_s7 + $0x120] sm:$0xff]  }
 0xafb   : > { %v2582_v48 = vmax.f32 %v2522_v44, 0.0  ;;  %v3864_v44 = vld [vmem:[%s4985_s30 + $0x108] sm:$0xff]  }
 0xafc   : > { %v2598_v49 = vpack.c.bf16 %v2584_v46, %v2583_v45  ;;  %v3863_v45 = vld [vmem:[%s4985_s30 + $0x100] sm:$0xff]   ;;  %v3806_v46 = vunpack.c.l.bf16 %v3864_v44 }
 0xafd   : > { %v2597_v50 = vpack.c.bf16 %v2582_v48, %v2581_v47  ;;  %v4503_v51 = vpop.f32.mrb[84].mxu1  ;;  %v3807_v47 = vunpack.c.h.bf16 %v3864_v44  ;;  %v4749_v44 = vld [vmem:[%s5375_s7 + $0x130] sm:$0xff]  }
 0xafe   : > { %v2543_v52 = vadd.f32 %v4503_v51, %v3583_v29  ;;  %v2534_v53 = vpop.f32.mrb[85].mxu1 }
 0xaff   : > { %v2535_v54 = vadd.f32 %v3583_v29, %v2534_v53  ;;  %v4504_v55 = vpop.f32.mrb[86].mxu1  ;;  %4513 = vmatprep.subr.bf16.mxu0 %v2597_v50 }
 0xb00   : > { %v2546_v57 = vadd.f32 %v4504_v55, %v3583_v29  ;;  %v2537_v58 = vpop.f32.mrb[87].mxu1  ;;  %4514 = vmatpush3.bf16.msra.mxu0 %v2597_v50  ;;  %v2587_v59 = vmax.f32 %v2543_v52, 0.0  ;;  %v3803_v50 = vunpack.c.h.bf16 %v3863_v45 }
 0xb01   : > { %v2538_v56 = vadd.f32 %v3583_v29, %v2537_v58  ;;  %4515 = vmatprep.subr.bf16.mxu0 %v2598_v49  ;;  %v2585_v60 = vmax.f32 %v2535_v54, 0.0 }
 0xb02   : > { %v2588_v16 = vmax.f32 %v2546_v57, 0.0 }
 0xb03   : > { %v2586_v61 = vmax.f32 %v2538_v56, 0.0  ;;  %v3866_v56 = vld [vmem:[%s4985_s30 + $0x118] sm:$0xff]  }
 0xb04   : > { %v2600_v31 = vpack.c.bf16 %v2588_v16, %v2587_v59  ;;  %4516 = vmatpush3.bf16.msra.mxu0 %v2598_v49  ;;  %v3802_v49 = vunpack.c.l.bf16 %v3863_v45  ;;  %v3865_v16 = vld [vmem:[%s4985_s30 + $0x110] sm:$0xff]   ;;  %v4750_v45 = vld [vmem:[%s5375_s7 + $0x138] sm:$0xff]  }
 0xb05   : > { %v2599_v32 = vpack.c.bf16 %v2586_v61, %v2585_v60  ;;  %v4507_v33 = vpop.f32.mrb[88].mxu1  ;;  %v3814_v61 = vunpack.c.l.bf16 %v3866_v56 }
 0xb06   : > { %v2559_v2 = vadd.f32 %v4507_v33, %v3583_v29  ;;  %v2550_v3 = vpop.f32.mrb[89].mxu1  ;;  %v3810_v33 = vunpack.c.l.bf16 %v3865_v16 }
 0xb07   : > { %v2551_v4 = vadd.f32 %v3583_v29, %v2550_v3  ;;  %v4508_v5 = vpop.f32.mrb[90].mxu1  ;;  %4517 = vmatprep.subr.bf16.mxu0 %v2599_v32 }
 0xb08   : > { %v2562_v6 = vadd.f32 %v4508_v5, %v3583_v29  ;;  %v2553_v7 = vpop.f32.mrb[91].mxu1  ;;  %4518 = vmatpush3.bf16.msra.mxu0 %v2599_v32  ;;  %v2591_v9 = vmax.f32 %v2559_v2, 0.0  ;;  %v3811_v2 = vunpack.c.h.bf16 %v3865_v16 }
 0xb09   : > { %v2554_v8 = vadd.f32 %v3583_v29, %v2553_v7  ;;  %4519 = vmatprep.subr.bf16.mxu0 %v2600_v31  ;;  %v2589_v11 = vmax.f32 %v2551_v4, 0.0 }
 0xb0a   : > { %v2592_v10 = vmax.f32 %v2562_v6, 0.0 }
 0xb0b   : > { %v2590_v12 = vmax.f32 %v2554_v8, 0.0 }
 0xb0c   : > { %v2602_v13 = vpack.c.bf16 %v2592_v10, %v2591_v9  ;;  %4520 = vmatpush3.bf16.msra.mxu0 %v2600_v31  ;;  %v3815_v31 = vunpack.c.h.bf16 %v3866_v56  ;;  %v3868_v10 = vld [vmem:[%s4985_s30 + $0x128] sm:$0xff]  }
 0xb0d   : > { %v2601_v14 = vpack.c.bf16 %v2590_v12, %v2589_v11  ;;  %v4511_v15 = vpop.f32.mrb[92].mxu1  ;;  %v3867_v12 = vld [vmem:[%s4985_s30 + $0x120] sm:$0xff]  }
 0xb0e   : > { %v2575_v17 = vadd.f32 %v4511_v15, %v3583_v29  ;;  %v2566_v18 = vpop.f32.mrb[93].mxu1  ;;  %v3823_v15 = vunpack.c.h.bf16 %v3868_v10 }
 0xb0f   : > { %v2567_v19 = vadd.f32 %v3583_v29, %v2566_v18  ;;  %v4512_v20 = vpop.f32.mrb[94].mxu1  ;;  %4521 = vmatprep.subr.bf16.mxu0 %v2601_v14  ;;  %v3818_v18 = vunpack.c.l.bf16 %v3867_v12 }
 0xb10   : > { %v2578_v22 = vadd.f32 %v4512_v20, %v3583_v29  ;;  %v2569_v23 = vpop.f32.mrb[95].mxu1  ;;  %4522 = vmatpush3.bf16.msra.mxu0 %v2601_v14  ;;  %v2595_v24 = vmax.f32 %v2575_v17, 0.0  ;;  %v3822_v14 = vunpack.c.l.bf16 %v3868_v10 }
 0xb11   : > { %v2570_v21 = vadd.f32 %v3583_v29, %v2569_v23  ;;  %4523 = vmatprep.subr.bf16.mxu0 %v2602_v13  ;;  %v2593_v25 = vmax.f32 %v2567_v19, 0.0  ;;  %v4741_v29 = vld [vmem:[%s5373_s5 + $0x130] sm:$0xff]   ;;  %v3819_v19 = vunpack.c.h.bf16 %v3867_v12 }
 0xb12   : > { %v2596_v62 = vmax.f32 %v2578_v22, 0.0  ;;  %4557 = vmatprep.subr.bf16.mxu1 %v4741_v29 }
 0xb13   : > { %v2594_v26 = vmax.f32 %v2570_v21, 0.0  ;;  %4558 = vmatpush3.bf16.msra.mxu1 %v4741_v29 }
 0xb14   : > { %v2604_v34 = vpack.c.bf16 %v2596_v62, %v2595_v24  ;;  %4524 = vmatpush3.bf16.msra.mxu0 %v2602_v13  ;;  %4559 = vmatprep.subr.bf16.mxu1 %v4742_v30 }
 0xb15   : > { %v2603_v35 = vpack.c.bf16 %v2594_v26, %v2593_v25  ;;  %v3870_v26 = vld [vmem:[%s4985_s30 + $0x138] sm:$0xff]  }
 0xb17   : > { %4525 = vmatprep.subr.bf16.mxu0 %v2603_v35  ;;  %4560 = vmatpush3.bf16.msra.mxu1 %v4742_v30 }
 0xb18   : > { %4526 = vmatpush3.bf16.msra.mxu0 %v2603_v35  ;;  %v3869_v35 = vld [vmem:[%s4985_s30 + $0x130] sm:$0xff]  }
 0xb19   : > { %4527 = vmatprep.subr.bf16.mxu0 %v2604_v34 }
 0xb1c   : > { %4528 = vmatpush3.bf16.msra.mxu0 %v2604_v34 }
 0xb1d   : > { %4577 = vmatprep.subr.bf16.mxu0 %v4743_v38 }
 0xb1f   : > { %4530 = vmatmul.mubr.bf16.vlgmr.msra.gmra.mrb[96].mxu0 %v4770_v36 }
 0xb20   : > { %4533 = vmatprep.mubr.bf16.mxu0 %v4771_v37  ;;  %4578 = vmatpush3.bf16.msra.mxu0 %v4743_v38  ;;  %v3830_v37 = vunpack.c.l.bf16 %v3870_v26 }
 0xb21   : > { %4579 = vmatprep.subr.bf16.mxu0 %v4744_v39 }
 0xb24   : > { %4580 = vmatpush3.bf16.msra.mxu0 %v4744_v39 }
 0xb25   : > { %4581 = vmatprep.subr.bf16.mxu0 %v4745_v40 }
 0xb27   : > { %4534 = vmatmul.mubr.bf16.gmra.mrb[100].mxu0 %v4772_v63  ;;  %v3831_v63 = vunpack.c.h.bf16 %v3870_v26 }
 0xb28   : > { %4537 = vmatprep.mubr.bf16.mxu0 %v4773_v0  ;;  %4582 = vmatpush3.bf16.msra.mxu0 %v4745_v40 }
 0xb29   : > { %4583 = vmatprep.subr.bf16.mxu0 %v4746_v41 }
 0xb2c   : > { %4584 = vmatpush3.bf16.msra.mxu0 %v4746_v41 }
 0xb2d   : > { %4585 = vmatprep.subr.bf16.mxu0 %v4747_v42 }
 0xb2f   : > { %4538 = vmatmul.mubr.bf16.gmra.mrb[104].mxu0 %v4774_v1  ;;  %v3826_v1 = vunpack.c.l.bf16 %v3869_v35 }
 0xb30   : > { %4541 = vmatprep.mubr.bf16.mxu0 %v4775_v27  ;;  %4586 = vmatpush3.bf16.msra.mxu0 %v4747_v42  ;;  %v3827_v27 = vunpack.c.h.bf16 %v3869_v35 }
 0xb31   : > { %4587 = vmatprep.subr.bf16.mxu0 %v4748_v43 }
 0xb34   : > { %4588 = vmatpush3.bf16.msra.mxu0 %v4748_v43 }
 0xb35   : > { %4589 = vmatprep.subr.bf16.mxu0 %v4749_v44 }
 0xb37   : > { %4542 = vmatmul.mubr.bf16.gmra.mrb[108].mxu0 %v4776_v28 }
 0xb38   : > { %4590 = vmatpush3.bf16.msra.mxu0 %v4749_v44  ;;  %v3160_v44 = vstv %s3110_s0 }
 0xb39   : > { %4591 = vmatprep.subr.bf16.mxu0 %v4750_v45  ;;  %4759 = vrcp.f32 %v3160_v44 }
 0xb3c   : > { %4592 = vmatpush3.bf16.msra.mxu0 %v4750_v45  ;;  %v4755_v45 = vld [vmem:[%s5377_s9 + $0x20] sm:$0xff]  }
 0xbf2   : > { %v4531_v48 = vpop.f32.mrb[96].mxu0 }
 0xbf3   : > { %v2672_v51 = vpop.f32.mrb[97].mxu0  ;;  %v2681_v53 = vadd.f32 %v4531_v48, %v3806_v46  ;;  %v3625_v46 = vld [vmem:[%s5374_s6 + $0x4] ss:$0 sm:$0xff] }
 0xbf4   : > { %v4532_v52 = vpop.f32.mrb[98].mxu0  ;;  %v2673_v57 = vadd.f32 %v3802_v49, %v2672_v51 }
 0xbf5   : > { %v2684_v54 = vadd.f32 %v4532_v52, %v3807_v47  ;;  %v2675_v55 = vpop.f32.mrb[99].mxu0 }
 0xbf6   : > { %v2676_v58 = vadd.f32 %v3803_v50, %v2675_v55 }
 0xbf7   : > { %v2736_v59 = vpack.c.bf16 %v2684_v54, %v2681_v53 }
 0xbf8   : > { %v2735_v60 = vpack.c.bf16 %v2676_v58, %v2673_v57 }
 0xbfa   : > { %v4535_v32 = vpop.f32.mrb[100].mxu0  ;;  %4561 = vmatprep.mubr.bf16.mxu1 %v2735_v60 }
 0xbfb   : > { %v2688_v3 = vpop.f32.mrb[101].mxu0  ;;  %4562 = vmatmul.mubr.bf16.vlgmr.msra.gmra.mrb[96].mxu1 %v2736_v59  ;;  %v2697_v5 = vadd.f32 %v4535_v32, %v3814_v61 }
 0xbfc   : > { %v4536_v4 = vpop.f32.mrb[102].mxu0  ;;  %v2689_v8 = vadd.f32 %v3810_v33, %v2688_v3 }
 0xbfd   : > { %v2700_v6 = vadd.f32 %v4536_v4, %v3815_v31  ;;  %v2691_v7 = vpop.f32.mrb[103].mxu0 }
 0xbfe   : > { %v2692_v9 = vadd.f32 %v3811_v2, %v2691_v7 }
 0xbff   : > { %v2738_v11 = vpack.c.bf16 %v2700_v6, %v2697_v5 }
 0xc00   : > { %v2737_v13 = vpack.c.bf16 %v2692_v9, %v2689_v8 }
 0xc02   : > { %v4539_v17 = vpop.f32.mrb[104].mxu0  ;;  %4565 = vmatprep.mubr.bf16.mxu1 %v2737_v13 }
 0xc03   : > { %v2704_v20 = vpop.f32.mrb[105].mxu0  ;;  %4566 = vmatmul.mubr.bf16.gmra.mrb[100].mxu1 %v2738_v11  ;;  %v2713_v23 = vadd.f32 %v4539_v17, %v3822_v14 }
 0xc04   : > { %v4540_v22 = vpop.f32.mrb[106].mxu0  ;;  %v2705_v62 = vadd.f32 %v3818_v18, %v2704_v20 }
 0xc05   : > { %v2716_v21 = vadd.f32 %v4540_v22, %v3823_v15  ;;  %v2707_v24 = vpop.f32.mrb[107].mxu0 }
 0xc06   : > { %v2708_v25 = vadd.f32 %v3819_v19, %v2707_v24 }
 0xc07   : > { %v2740_v34 = vpack.c.bf16 %v2716_v21, %v2713_v23 }
 0xc08   : > { %v2739_v36 = vpack.c.bf16 %v2708_v25, %v2705_v62 }
 0xc0a   : > { %v4543_v0 = vpop.f32.mrb[108].mxu0  ;;  %4569 = vmatprep.mubr.bf16.mxu1 %v2739_v36 }
 0xc0b   : > { %v2720_v28 = vpop.f32.mrb[109].mxu0  ;;  %4570 = vmatmul.mubr.bf16.gmra.mrb[104].mxu1 %v2740_v34  ;;  %v2729_v30 = vadd.f32 %v4543_v0, %v3830_v37 }
 0xc0c   : > { %v4544_v29 = vpop.f32.mrb[110].mxu0  ;;  %v2721_v40 = vadd.f32 %v3826_v1, %v2720_v28 }
 0xc0d   : > { %v2732_v38 = vadd.f32 %v4544_v29, %v3831_v63  ;;  %v2723_v39 = vpop.f32.mrb[111].mxu0 }
 0xc0e   : > { %v2724_v41 = vadd.f32 %v3827_v27, %v2723_v39  ;;  %v4800_v39 = vmov 0.0  }
 0xc0f   : > { %v2742_v42 = vpack.c.bf16 %v2732_v38, %v2729_v30  ;;  %4609 = vmatprep.subr.bf16.mxu1 %v4800_v39  ;;  %4629 = vmatprep.subr.bf16.mxu0 %v4800_v39 }
 0xc10   : > { %v2741_v43 = vpack.c.bf16 %v2724_v41, %v2721_v40  ;;  %v4751_v40 = vld [vmem:[%s5377_s9] sm:$0xff]   ;;  %v4752_v41 = vld [vmem:[%s5377_s9 + $0x8] sm:$0xff]  }
 0xc12   : > { %4573 = vmatprep.mubr.bf16.mxu1 %v2741_v43  ;;  %v4754_v43 = vld [vmem:[%s5377_s9 + $0x18] sm:$0xff]  }
 0xc13   : > { %4574 = vmatmul.mubr.bf16.gmra.mrb[108].mxu1 %v2742_v42  ;;  %v4753_v42 = vld [vmem:[%s5377_s9 + $0x10] sm:$0xff]  }
 0xc14   : > { %4625 = vmatprep.mubr.msk.bf16.mxu1 %vm4801_vm0, %v4800_v39 }
 0xcce   : > { %v4563_v47 = vpop.f32.mrb[96].mxu1 }
 0xccf   : > { %v2859_v48 = vadd.f32 %v4563_v47, %v3625_v46  ;;  %v2850_v49 = vpop.f32.mrb[97].mxu1  ;;  %v4757_v47 = vld [vmem:[%s5377_s9 + $0x30] sm:$0xff]  }
 0xcd0   : > { %v2851_v50 = vadd.f32 %v3625_v46, %v2850_v49  ;;  %v4564_v51 = vpop.f32.mrb[98].mxu1 }
 0xcd1   : > { %v2862_v52 = vadd.f32 %v4564_v51, %v3625_v46  ;;  %v2853_v53 = vpop.f32.mrb[99].mxu1  ;;  %v2915_v55 = vmax.f32 %v2859_v48, 0.0  ;;  %v4760_v48 = vpop.eup %4759 }
 0xcd2   : > { %v2854_v54 = vadd.f32 %v3625_v46, %v2853_v53  ;;  %v2913_v58 = vmax.f32 %v2851_v50, 0.0  ;;  %4650 = vpush %v4760_v48  ;;  %v3651_v50 = vld [vmem:[%s5376_s8 + $0x4] ss:$0 sm:$0xff] }
 0xcd3   : > { %v2916_v57 = vmax.f32 %v2862_v52, 0.0 }
 0xcd4   : > { %v2914_v56 = vmax.f32 %v2854_v54, 0.0 }
 0xcd5   : > { %v2930_v59 = vpack.c.bf16 %v2916_v57, %v2915_v55 }
 0xcd6   : > { %v2929_v16 = vpack.c.bf16 %v2914_v56, %v2913_v58  ;;  %v4567_v60 = vpop.f32.mrb[100].mxu1 }
 0xcd7   : > { %v2875_v61 = vadd.f32 %v4567_v60, %v3625_v46  ;;  %v2866_v31 = vpop.f32.mrb[101].mxu1 }
 0xcd8   : > { %v2867_v32 = vadd.f32 %v3625_v46, %v2866_v31  ;;  %v4568_v33 = vpop.f32.mrb[102].mxu1  ;;  %4593 = vmatprep.mubr.bf16.mxu0 %v2929_v16 }
 0xcd9   : > { %v2878_v2 = vadd.f32 %v4568_v33, %v3625_v46  ;;  %v2869_v3 = vpop.f32.mrb[103].mxu1  ;;  %4594 = vmatmul.mubr.bf16.vlgmr.msra.gmra.mrb[112].mxu0 %v2930_v59  ;;  %v2919_v5 = vmax.f32 %v2875_v61, 0.0 }
 0xcda   : > { %v2870_v4 = vadd.f32 %v3625_v46, %v2869_v3  ;;  %v2917_v7 = vmax.f32 %v2867_v32, 0.0  ;;  %4630 = vmatpush3.bf16.msra.mxu0 %v4751_v40 }
 0xcdb   : > { %v2920_v6 = vmax.f32 %v2878_v2, 0.0  ;;  %4631 = vmatprep.subr.bf16.mxu0 %v4800_v39 }
 0xcdc   : > { %v2918_v8 = vmax.f32 %v2870_v4, 0.0 }
 0xcdd   : > { %v2932_v9 = vpack.c.bf16 %v2920_v6, %v2919_v5 }
 0xcde   : > { %v2931_v10 = vpack.c.bf16 %v2918_v8, %v2917_v7  ;;  %v4571_v11 = vpop.f32.mrb[104].mxu1  ;;  %4632 = vmatpush3.bf16.msra.mxu0 %v4752_v41 }
 0xcdf   : > { %v2891_v12 = vadd.f32 %v4571_v11, %v3625_v46  ;;  %v2882_v13 = vpop.f32.mrb[105].mxu1  ;;  %4633 = vmatprep.subr.bf16.mxu0 %v4800_v39 }
 0xce0   : > { %v2883_v14 = vadd.f32 %v3625_v46, %v2882_v13  ;;  %v4572_v15 = vpop.f32.mrb[106].mxu1  ;;  %4597 = vmatprep.mubr.bf16.mxu0 %v2931_v10 }
 0xce1   : > { %v2894_v17 = vadd.f32 %v4572_v15, %v3625_v46  ;;  %v2885_v18 = vpop.f32.mrb[107].mxu1  ;;  %4598 = vmatmul.mubr.bf16.gmra.mrb[116].mxu0 %v2932_v9  ;;  %v2923_v20 = vmax.f32 %v2891_v12, 0.0 }
 0xce2   : > { %v2886_v19 = vadd.f32 %v3625_v46, %v2885_v18  ;;  %v2921_v23 = vmax.f32 %v2883_v14, 0.0  ;;  %4634 = vmatpush3.bf16.msra.mxu0 %v4753_v42 }
 0xce3   : > { %v2924_v22 = vmax.f32 %v2894_v17, 0.0  ;;  %4635 = vmatprep.subr.bf16.mxu0 %v4800_v39 }
 0xce4   : > { %v2922_v21 = vmax.f32 %v2886_v19, 0.0 }
 0xce5   : > { %v2934_v24 = vpack.c.bf16 %v2924_v22, %v2923_v20 }
 0xce6   : > { %v2933_v62 = vpack.c.bf16 %v2922_v21, %v2921_v23  ;;  %v4575_v25 = vpop.f32.mrb[108].mxu1  ;;  %4636 = vmatpush3.bf16.msra.mxu0 %v4754_v43 }
 0xce7   : > { %v2907_v26 = vadd.f32 %v4575_v25, %v3625_v46  ;;  %v2898_v34 = vpop.f32.mrb[109].mxu1  ;;  %4637 = vmatprep.subr.bf16.mxu0 %v4800_v39 }
 0xce8   : > { %v2899_v35 = vadd.f32 %v3625_v46, %v2898_v34  ;;  %v4576_v36 = vpop.f32.mrb[110].mxu1  ;;  %4601 = vmatprep.mubr.bf16.mxu0 %v2933_v62  ;;  %v4758_v34 = vld [vmem:[%s5377_s9 + $0x38] sm:$0xff]  }
 0xce9   : > { %v2910_v37 = vadd.f32 %v4576_v36, %v3625_v46  ;;  %v2901_v63 = vpop.f32.mrb[111].mxu1  ;;  %4602 = vmatmul.mubr.bf16.gmra.mrb[120].mxu0 %v2934_v24  ;;  %v2927_v1 = vmax.f32 %v2907_v26, 0.0  ;;  %v3111_v26 = vld [vmem:[%s413_s12] sm:$0x1] }
 0xcea   : > { %v2902_v0 = vadd.f32 %v3625_v46, %v2901_v63  ;;  %v2925_v28 = vmax.f32 %v2899_v35, 0.0  ;;  %4638 = vmatpush3.bf16.msra.mxu0 %v4755_v45  ;;  %v4756_v46 = vld [vmem:[%s5377_s9 + $0x28] sm:$0xff]  }
 0xceb   : > { %v2928_v27 = vmax.f32 %v2910_v37, 0.0  ;;  %4639 = vmatprep.subr.bf16.mxu0 %v4800_v39 }
 0xcec   : > { %v2926_v29 = vmax.f32 %v2902_v0, 0.0 }
 0xced   : > { %v2936_v30 = vpack.c.bf16 %v2928_v27, %v2927_v1 }
 0xcee   : > { %v2935_v38 = vpack.c.bf16 %v2926_v29, %v2925_v28  ;;  %4640 = vmatpush3.bf16.msra.mxu0 %v4756_v46  ;;  %v3182_v28 = vld [vmem:[%s5378_s10] sm:$0x1] }
 0xcef   : > { %4641 = vmatprep.subr.bf16.mxu0 %v4800_v39 }
 0xcf0   : > { %4605 = vmatprep.mubr.bf16.mxu0 %v2935_v38 }
 0xcf1   : > { %4606 = vmatmul.mubr.bf16.gmra.mrb[124].mxu0 %v2936_v30 }
 0xcf2   : > { %4645 = vmatprep.mubr.msk.bf16.mxu0 %vm4801_vm0, %v4800_v39  ;;  %4642 = vmatpush3.bf16.msra.mxu0 %v4757_v47 }
 0xcf3   : > { %4643 = vmatprep.subr.bf16.mxu0 %v4800_v39 }
 0xcf6   : > { %4644 = vmatpush3.bf16.msra.mxu0 %v4758_v34 }
 0xd03   : > { %s4651_s14 = spop %4650 }
 0xd04   : > { %v3163_v35 = vstv %s4651_s14 }
 0xdac   : > { %v4595_v49 = vpop.f32.mrb[112].mxu0 }
 0xdad   : > { %v3044_v51 = vpop.f32.mrb[113].mxu0  ;;  %v3053_v53 = vadd.f32 %v4595_v49, %v3651_v50 }
 0xdae   : > { %v4596_v52 = vpop.f32.mrb[114].mxu0  ;;  %v3045_v57 = vadd.f32 %v3651_v50, %v3044_v51 }
 0xdaf   : > { %v3056_v54 = vadd.f32 %v4596_v52, %v3651_v50  ;;  %v3047_v55 = vpop.f32.mrb[115].mxu0 }
 0xdb0   : > { %v3048_v58 = vadd.f32 %v3651_v50, %v3047_v55 }
 0xdb1   : > { %v3113_v56 = vpack.c.bf16 %v3056_v54, %v3053_v53 }
 0xdb2   : > { %v3112_v59 = vpack.c.bf16 %v3048_v58, %v3045_v57 }
 0xdb4   : > { %v4599_v16 = vpop.f32.mrb[116].mxu0  ;;  %4610 = vmatpush3.bf16.msra.mxu1 %v3112_v59 }
 0xdb5   : > { %v3060_v60 = vpop.f32.mrb[117].mxu0  ;;  %4611 = vmatprep.subr.bf16.mxu1 %v4800_v39  ;;  %v3069_v31 = vadd.f32 %v4599_v16, %v3651_v50 }
 0xdb6   : > { %v4600_v61 = vpop.f32.mrb[118].mxu0  ;;  %v3061_v2 = vadd.f32 %v3651_v50, %v3060_v60 }
 0xdb7   : > { %v3072_v32 = vadd.f32 %v4600_v61, %v3651_v50  ;;  %v3063_v33 = vpop.f32.mrb[119].mxu0 }
 0xdb8   : > { %v3064_v3 = vadd.f32 %v3651_v50, %v3063_v33  ;;  %4612 = vmatpush3.bf16.msra.mxu1 %v3113_v56 }
 0xdb9   : > { %v3115_v4 = vpack.c.bf16 %v3072_v32, %v3069_v31  ;;  %4613 = vmatprep.subr.bf16.mxu1 %v4800_v39 }
 0xdba   : > { %v3114_v5 = vpack.c.bf16 %v3064_v3, %v3061_v2 }
 0xdbc   : > { %v4603_v6 = vpop.f32.mrb[120].mxu0  ;;  %4614 = vmatpush3.bf16.msra.mxu1 %v3114_v5 }
 0xdbd   : > { %v3076_v7 = vpop.f32.mrb[121].mxu0  ;;  %4615 = vmatprep.subr.bf16.mxu1 %v4800_v39  ;;  %v3085_v9 = vadd.f32 %v4603_v6, %v3651_v50 }
 0xdbe   : > { %v4604_v8 = vpop.f32.mrb[122].mxu0  ;;  %v3077_v12 = vadd.f32 %v3651_v50, %v3076_v7 }
 0xdbf   : > { %v3088_v10 = vadd.f32 %v4604_v8, %v3651_v50  ;;  %v3079_v11 = vpop.f32.mrb[123].mxu0 }
 0xdc0   : > { %v3080_v13 = vadd.f32 %v3651_v50, %v3079_v11  ;;  %4616 = vmatpush3.bf16.msra.mxu1 %v3115_v4 }
 0xdc1   : > { %v3117_v14 = vpack.c.bf16 %v3088_v10, %v3085_v9  ;;  %4617 = vmatprep.subr.bf16.mxu1 %v4800_v39 }
 0xdc2   : > { %v3116_v15 = vpack.c.bf16 %v3080_v13, %v3077_v12 }
 0xdc4   : > { %v4607_v17 = vpop.f32.mrb[124].mxu0  ;;  %4618 = vmatpush3.bf16.msra.mxu1 %v3116_v15 }
 0xdc5   : > { %v3092_v18 = vpop.f32.mrb[125].mxu0  ;;  %4619 = vmatprep.subr.bf16.mxu1 %v4800_v39  ;;  %v3101_v20 = vadd.f32 %v4607_v17, %v3651_v50 }
 0xdc6   : > { %v4608_v19 = vpop.f32.mrb[126].mxu0  ;;  %v3093_v21 = vadd.f32 %v3651_v50, %v3092_v18 }
 0xdc7   : > { %v3104_v22 = vadd.f32 %v4608_v19, %v3651_v50  ;;  %v3095_v23 = vpop.f32.mrb[127].mxu0 }
 0xdc8   : > { %v3096_v24 = vadd.f32 %v3651_v50, %v3095_v23  ;;  %4620 = vmatpush3.bf16.msra.mxu1 %v3117_v14 }
 0xdc9   : > { %v3119_v62 = vpack.c.bf16 %v3104_v22, %v3101_v20  ;;  %4621 = vmatprep.subr.bf16.mxu1 %v4800_v39 }
 0xdca   : > { %v3118_v25 = vpack.c.bf16 %v3096_v24, %v3093_v21 }
 0xdcc   : > { %4622 = vmatpush3.bf16.msra.mxu1 %v3118_v25 }
 0xdcd   : > { %4623 = vmatprep.subr.bf16.mxu1 %v4800_v39 }
 0xdd0   : > { %4624 = vmatpush3.bf16.msra.mxu1 %v3119_v62 }
 0xdd3   : > { %4626 = vmatmul.mubr.bf16.vlgmr.msra.gmra.mrb[112].mxu1 %v3111_v26 }
 0xea6   : > { %v3154_v36 = vpop.f32.mrb[112].mxu1 }
 0xea7   : > { %v3164_v37 = vmul.f32 %v3163_v35, %v3154_v36  ;;  %v4627_v63 = vpop.f32.mrb[113].mxu1 }
 0xea8   : > { %v3157_v0 = vpop.f32.mrb[114].mxu1 }
 0xea9   : > { %v3165_v1 = vpack.c.bf16 %v3164_v37, %v3164_v37  ;;  %v4628_v27 = vpop.f32.mrb[115].mxu1 }
 0xeab   : > { %4646 = vmatmul.mubr.bf16.vlgmr.msra.gmra.mrb[128].mxu0 %v3165_v1 }
 0xf7e   : > { %v3265_v29 = vpop.f32.mrb[128].mxu0 }
 0xf7f   : > { %v3266_v30 = vadd.f32 %v3265_v29, %v3182_v28  ;;  %v4647_v38 = vpop.f32.mrb[129].mxu0 }
 0xf80   : > { %v3268_v39 = vpop.f32.mrb[130].mxu0 }
 0xf81   : > { %3271 = vst [vmem:[%s416_s18] sm:$0x1] %v3266_v30  ;;  %v4648_v40 = vpop.f32.mrb[131].mxu0 }
 0xf82 PF: > { %s27_s22 = sadd.s32 1, %s4797_s22  }
 0xf83   : > { %p24_p10 = scmp.ge.s32.totalorder %s27_s22, 6  }
 0xf85   :  { %26 = sbr.rel (!%p24_p10) target bundleno = 16 (0x10), region = 119 }

</bundles_post_ra>
